<compile_context>
chip_gen: v7x
topology: tpu7x:2x2x1
jax: 0.10.0
libtpu: 0.0.40
codegen_flags: <defaults>
</compile_context>

<pallas_src>
import jax
import jax.numpy as jnp
from jax.experimental import pallas as pl
from jax.experimental.pallas import tpu as pltpu

LANE = 128


def _round_up(v, m):
    return (v + m - 1) // m * m


def _pick_tile(total, cap):
    """Largest multiple of 128 that divides `total` and is <= cap (total % 128 == 0)."""
    t = min(total, cap)
    while total % t:
        t -= LANE
    return t


# --------------------------------- kernel -----------------------------------

def _fused_sage_kernel(a_ref, dinv_ref, xk_ref, xi_ref, wl1_ref, wr1_ref,
                       b1_ref, w2_ref, b2_ref, o_ref,
                       acc1_ref, acc2_ref, zl_ref, zr_ref):
    """Two-phase fused BipartiteEncoder forward.

    phase 0 (per row tile i, reduced over k):
        agg1 = (sum_k A[i,k] @ x[k]) * deg_inv[i]            (mean aggregation)
        h1   = relu(agg1 @ Wl1 + x[i] @ Wr1 + b1)            (dropout = eval identity)
        z[i] = h1 @ [Wl2 | Wr2]   -> z_left (bf16) / z_right (f32) VMEM scratch
    phase 1 (per row tile i, reduced over k):
        out[i] = (sum_k A[i,k] @ z_left[k]) * deg_inv[i] + z_right[i] + b2
    """
    phase = pl.program_id(0)
    i = pl.program_id(1)
    k = pl.program_id(2)
    last_k = pl.num_programs(2) - 1
    tm, fo = o_ref.shape
    tk = xk_ref.shape[0]

    @pl.when(k == 0)
    def _init():
        acc1_ref[...] = jnp.zeros_like(acc1_ref)
        acc2_ref[...] = jnp.zeros_like(acc2_ref)

    # Unnormalized 0/1(+multiplicity) counts: exact in bf16; int8 in HBM halves
    # the dominant N^2 byte stream.
    a = a_ref[...].astype(jnp.bfloat16)

    @pl.when(phase == 0)
    def _layer1():
        acc1_ref[...] += jnp.dot(a, xk_ref[...],
                                 preferred_element_type=jnp.float32)

        @pl.when(k == last_k)
        def _finalize1():
            # Mean aggregation: exact integer-count sum scaled by f32 1/deg.
            agg = (acc1_ref[...] * dinv_ref[...]).astype(jnp.bfloat16)
            # Two accumulating dots instead of a (tm, 2*fi) concat relayout.
            h1 = jnp.dot(agg, wl1_ref[...], preferred_element_type=jnp.float32)
            h1 = h1 + jnp.dot(xi_ref[...], wr1_ref[...],
                              preferred_element_type=jnp.float32)
            h1 = jnp.maximum(h1 + b1_ref[...], 0.0)    # bias + ReLU in f32
            # Dropout(p=0.5): inference-mode identity.
            # Fused layer-2 projection: one 2*fo-wide MXU pass.
            z = jnp.dot(h1.astype(jnp.bfloat16), w2_ref[...],
                        preferred_element_type=jnp.float32)
            row0 = pl.multiple_of(i * tm, tm)
            zl_ref[pl.ds(row0, tm), :] = z[:, :fo].astype(jnp.bfloat16)
            zr_ref[pl.ds(row0, tm), :] = z[:, fo:]

    @pl.when(phase == 1)
    def _layer2():
        col0 = pl.multiple_of(k * tk, tk)
        acc2_ref[...] += jnp.dot(a, zl_ref[pl.ds(col0, tk), :],
                                 preferred_element_type=jnp.float32)

        @pl.when(k == last_k)
        def _finalize2():
            row0 = pl.multiple_of(i * tm, tm)
            o_ref[...] = (acc2_ref[...] * dinv_ref[...]
                          + zr_ref[pl.ds(row0, tm), :]
                          + b2_ref[...]).astype(o_ref.dtype)


# --------------------------------- wrapper -----------------------------------

def bipartite_encoder(x, edge_index, params):
    """x: (N, in_dim) f32; edge_index: (2, E) int32 [src; dst] (dst aggregates src)."""
    n, in_dim = x.shape
    hidden = params["wl1"].shape[1]
    out_dim = params["wl2"].shape[1]

    # ---- pad: nodes to a 128 multiple (MXU-dense row tiles), features to 128 lanes
    n_pad = _round_up(n, LANE)
    fi = _round_up(in_dim, LANE)
    fh = _round_up(hidden, LANE)
    fo = _round_up(out_dim, LANE)

    # ---- glue: unnormalized dense adjacency built directly as int8 (exact counts),
    # plus an f32 per-row 1/deg vector applied inside the kernel.
    src, dst = edge_index[0], edge_index[1]
    a_p = jnp.zeros((n_pad, n_pad), jnp.int8).at[dst, src].add(1)
    deg = jnp.zeros((n_pad, 1), jnp.float32).at[dst, 0].add(1.0)
    dinv = 1.0 / jnp.maximum(deg, 1.0)          # zero in-degree -> scale 1 on zero sum
    # TODO(synk): on v7x store a_p as float8_e4m3 and feed the fp8 MXU directly.

    x_p = jnp.zeros((n_pad, fi), jnp.bfloat16).at[:n, :in_dim].set(
        x.astype(jnp.bfloat16))

    wl1 = jnp.zeros((fi, fh), jnp.bfloat16).at[:in_dim, :hidden].set(
        params["wl1"].astype(jnp.bfloat16))
    wr1 = jnp.zeros((fi, fh), jnp.bfloat16).at[:in_dim, :hidden].set(
        params["wr1"].astype(jnp.bfloat16))
    b1 = jnp.zeros((1, fh), jnp.float32).at[:, :hidden].set(params["b1"])
    # fused layer-2 projection weight [Wl2 | Wr2]
    w2 = jnp.zeros((fh, 2 * fo), jnp.bfloat16)
    w2 = w2.at[:hidden, :out_dim].set(params["wl2"].astype(jnp.bfloat16))
    w2 = w2.at[:hidden, fo:fo + out_dim].set(params["wr2"].astype(jnp.bfloat16))
    b2 = jnp.zeros((1, fo), jnp.float32).at[:, :out_dim].set(params["b2"])

    # ---- tiles: tm=256 fills a v6e/v7x MXU pass (128 native on v5e); K tiled.
    tm = _pick_tile(n_pad, 256)
    tk = _pick_tile(n_pad, 1024)
    grid = (2, n_pad // tm, n_pad // tk)     # (phase, row tile, neighbor tile)

    # z scratch (bf16 left half + f32 right half) must fit VMEM for the fused plan.
    assert n_pad * fo * (2 + 4) <= 48 * 1024 * 1024, \
        "z too large for fused single-call plan; see TODO at top of file"

    # Phase 1 needs z from ALL row tiles of phase 0 -> every axis is a sequential
    # ("arbitrary") dependency for this fused kernel.
    dims = ("arbitrary", "arbitrary", "arbitrary")
    const = pl.Buffered(1)   # grid-invariant blocks: no double-buffering

    cost = pl.CostEstimate(
        flops=(2 * n_pad * n_pad * fi           # layer-1 aggregation
               + 2 * 2 * n_pad * fi * fh        # lin_l + lin_r
               + 2 * n_pad * fh * (2 * fo)      # layer-2 projection
               + 2 * n_pad * n_pad * fo),       # layer-2 aggregation
        transcendentals=0,
        bytes_accessed=(2 * n_pad * n_pad       # int8 A, read once per phase
                        + 2 * n_pad * fi + 4 * n_pad
                        + 2 * (2 * fi * fh + fh * 2 * fo) + 4 * (fh + fo)
                        + 4 * n_pad * fo),
    )

    out_p = pl.pallas_call(
        _fused_sage_kernel,
        out_shape=jax.ShapeDtypeStruct((n_pad, fo), jnp.float32),
        grid_spec=pltpu.PrefetchScalarGridSpec(
            num_scalar_prefetch=0,
            grid=grid,
            in_specs=[
                # A row/col tile: needed in both phases.
                pl.BlockSpec((tm, tk), lambda p, i, k: (i, k)),
                # f32 1/deg for this row tile (both finalize branches).
                pl.BlockSpec((tm, 1), lambda p, i, k: (i, 0)),
                # x neighbor rows (phase 0 only -> parked on block 0 in phase 1).
                pl.BlockSpec((tk, fi), lambda p, i, k: ((1 - p) * k, 0)),
                # x self rows (phase-0 finalize only).
                pl.BlockSpec((tm, fi), lambda p, i, k: ((1 - p) * i, 0)),
                # grid-invariant weights / biases: single-buffered.
                pl.BlockSpec((fi, fh), lambda p, i, k: (0, 0), pipeline_mode=const),
                pl.BlockSpec((fi, fh), lambda p, i, k: (0, 0), pipeline_mode=const),
                pl.BlockSpec((1, fh), lambda p, i, k: (0, 0), pipeline_mode=const),
                pl.BlockSpec((fh, 2 * fo), lambda p, i, k: (0, 0), pipeline_mode=const),
                pl.BlockSpec((1, fo), lambda p, i, k: (0, 0), pipeline_mode=const),
            ],
            # Phase 0 parks the (unwritten) output on block 0; phase 1 writes row i,
            # so every output block is fully written before it is left.
            out_specs=pl.BlockSpec((tm, fo), lambda p, i, k: (p * i, 0)),
            scratch_shapes=[
                pltpu.VMEM((tm, fi), jnp.float32),       # layer-1 accumulator
                pltpu.VMEM((tm, fo), jnp.float32),       # layer-2 accumulator
                pltpu.VMEM((n_pad, fo), jnp.bfloat16),   # z_left  (A-aggregated branch)
                pltpu.VMEM((n_pad, fo), jnp.float32),    # z_right (root branch)
            ],
        ),
        compiler_params=pltpu.CompilerParams(
            dimension_semantics=dims,
            # Re-derive per generation: 128 MiB physical VMEM on v5e/v6e, 64 MiB on v7x.
            vmem_limit_bytes=64 * 1024 * 1024,
        ),
        cost_estimate=cost,
    )(a_p, dinv, x_p, x_p, wl1, wr1, b1, w2, b2)

    return out_p[:n, :out_dim]


# --------------------------------- reference / init --------------------------

def init_params(key, in_dim, hidden_dim, out_dim):
    """Deterministic init. Weights stored as (fan_in, fan_out) for x @ W."""
    ks = jax.random.split(key, 6)

    def lin(k, fi_, fo_):
        bound = 1.0 / jnp.sqrt(fi_)
        return jax.random.uniform(k, (fi_, fo_), jnp.float32, -bound, bound)

    return {
        "wl1": lin(ks[0], in_dim, hidden_dim),
        "wr1": lin(ks[1], in_dim, hidden_dim),
        "b1": jax.random.uniform(ks[2], (1, hidden_dim), jnp.float32,
                                 -1.0 / jnp.sqrt(in_dim), 1.0 / jnp.sqrt(in_dim)),
        "wl2": lin(ks[3], hidden_dim, out_dim),
        "wr2": lin(ks[4], hidden_dim, out_dim),
        "b2": jax.random.uniform(ks[5], (1, out_dim), jnp.float32,
                                 -1.0 / jnp.sqrt(hidden_dim), 1.0 / jnp.sqrt(hidden_dim)),
    }


def _reference(x, edge_index, params):
    """Pure-JAX f32 reference of the original forward pass."""
    n = x.shape[0]
    src, dst = edge_index[0], edge_index[1]
    adj = jnp.zeros((n, n), jnp.float32).at[dst, src].add(1.0)
    deg = adj.sum(axis=1, keepdims=True)
    adj = adj / jnp.maximum(deg, 1.0)
    h1 = jnp.maximum((adj @ x) @ params["wl1"] + params["b1"]
                     + x @ params["wr1"], 0.0)
    return (adj @ h1) @ params["wl2"] + params["b2"] + h1 @ params["wr2"]


if __name__ == "__main__":
    key = jax.random.PRNGKey(0)
    k_x, k_e, k_p = jax.random.split(key, 3)

    N, E = 16, 48                       # small bipartite-ish graph
    in_dim, hidden_dim, out_dim = 8, 32, 16

    x = jax.random.normal(k_x, (N, in_dim), jnp.float32)
    ks, kd = jax.random.split(k_e)
    src = jax.random.randint(ks, (E,), 0, N // 2)
    dst = jax.random.randint(kd, (E,), N // 2, N)
    edge_index = jnp.concatenate(
        [jnp.stack([src, dst]), jnp.stack([dst, src])], axis=1).astype(jnp.int32)

    params = init_params(k_p, in_dim, hidden_dim, out_dim)

    out = bipartite_encoder(x, edge_index, params)
    jax.block_until_ready(out)
    assert out.shape == (N, out_dim) and out.dtype == jnp.float32

    # Tighter than before: adjacency is exact integer counts and 1/deg is f32;
    # remaining error is bf16 rounding of x / h1 / z / weights (f32 accumulation).
    ref = _reference(x, edge_index, params)
    max_err = float(jnp.max(jnp.abs(out - ref)))
    assert max_err < 0.1, f"max abs error vs f32 reference = {max_err}"

    print("KERNEL_OK")
</pallas_src>

<mosaic_0001>
module attributes {stable_mosaic.version = 11 : i64} {
  func.func @_fused_sage_kernel(%arg0: i32, %arg1: i32, %arg2: i32, %arg3: memref<128x128xi8, #tpu.memory_space<vmem>>, %arg4: memref<128x1xf32, #tpu.memory_space<vmem>>, %arg5: memref<128x128xbf16, #tpu.memory_space<vmem>>, %arg6: memref<128x128xbf16, #tpu.memory_space<vmem>>, %arg7: memref<128x128xbf16, #tpu.memory_space<vmem>>, %arg8: memref<128x128xbf16, #tpu.memory_space<vmem>>, %arg9: memref<1x128xf32, #tpu.memory_space<vmem>>, %arg10: memref<128x256xbf16, #tpu.memory_space<vmem>>, %arg11: memref<1x128xf32, #tpu.memory_space<vmem>>, %arg12: memref<128x128xf32, #tpu.memory_space<vmem>>, %arg13: memref<128x128xf32, #tpu.memory_space<vmem>>, %arg14: memref<128x128xf32, #tpu.memory_space<vmem>>, %arg15: memref<128x128xbf16, #tpu.memory_space<vmem>>, %arg16: memref<128x128xf32, #tpu.memory_space<vmem>>) attributes {dimension_semantics = [#tpu.dimension_semantics<arbitrary>, #tpu.dimension_semantics<arbitrary>, #tpu.dimension_semantics<arbitrary>], iteration_bounds = array<i64: 2, 1, 1>, scalar_prefetch = 0 : i64, scratch_operands = 4 : i64, tpu.core_type = #tpu.core_type<tc>, window_params = [{transform_indices = @transform_0, window_bounds = array<i64: 128, 128>}, {transform_indices = @transform_1, window_bounds = array<i64: 128, 1>}, {transform_indices = @transform_2, window_bounds = array<i64: 128, 128>}, {transform_indices = @transform_3, window_bounds = array<i64: 128, 128>}, {pipeline_mode = #tpu.pipeline_mode<synchronous>, transform_indices = @transform_4, window_bounds = array<i64: 128, 128>}, {pipeline_mode = #tpu.pipeline_mode<synchronous>, transform_indices = @transform_5, window_bounds = array<i64: 128, 128>}, {pipeline_mode = #tpu.pipeline_mode<synchronous>, transform_indices = @transform_6, window_bounds = array<i64: 1, 128>}, {pipeline_mode = #tpu.pipeline_mode<synchronous>, transform_indices = @transform_7, window_bounds = array<i64: 128, 256>}, {pipeline_mode = #tpu.pipeline_mode<synchronous>, transform_indices = @transform_8, window_bounds = array<i64: 1, 128>}, {transform_indices = @transform_9, window_bounds = array<i64: 128, 128>}]} {
    %c0_i32 = arith.constant 0 : i32
    %0 = arith.cmpi eq, %arg2, %c0_i32 : i32
    %1 = arith.extui %0 : i1 to i32
    %c0_i32_0 = arith.constant 0 : i32
    %2 = arith.cmpi ne, %1, %c0_i32_0 : i32
    scf.if %2 {
      %cst = arith.constant 0.000000e+00 : f32
      %11 = vector.broadcast %cst : f32 to vector<128x128xf32>
      %c0_5 = arith.constant 0 : index
      %c0_6 = arith.constant 0 : index
      %12 = vector.load %arg13[%c0_5, %c0_6] : memref<128x128xf32, #tpu.memory_space<vmem>>, vector<128x128xf32>
      tpu.vector_store %arg13[%c0_5, %c0_6], %11 {strides = array<i32>} : memref<128x128xf32, #tpu.memory_space<vmem>>, vector<128x128xf32>,
      %cst_7 = arith.constant 0.000000e+00 : f32
      %13 = vector.broadcast %cst_7 : f32 to vector<128x128xf32>
      %c0_8 = arith.constant 0 : index
      %c0_9 = arith.constant 0 : index
      %14 = vector.load %arg14[%c0_8, %c0_9] : memref<128x128xf32, #tpu.memory_space<vmem>>, vector<128x128xf32>
      tpu.vector_store %arg14[%c0_8, %c0_9], %13 {strides = array<i32>} : memref<128x128xf32, #tpu.memory_space<vmem>>, vector<128x128xf32>,
    } else {
    }
    %c0 = arith.constant 0 : index
    %c0_1 = arith.constant 0 : index
    %3 = vector.load %arg3[%c0, %c0_1] : memref<128x128xi8, #tpu.memory_space<vmem>>, vector<128x128xi8>
    %4 = arith.sitofp %3 : vector<128x128xi8> to vector<128x128xbf16>
    %c0_i32_2 = arith.constant 0 : i32
    %5 = arith.cmpi eq, %arg0, %c0_i32_2 : i32
    %6 = arith.extui %5 : i1 to i32
    %c0_i32_3 = arith.constant 0 : i32
    %7 = arith.cmpi ne, %6, %c0_i32_3 : i32
    scf.if %7 {
      %c0_5 = arith.constant 0 : index
      %c0_6 = arith.constant 0 : index
      %11 = vector.load %arg13[%c0_5, %c0_6] : memref<128x128xf32, #tpu.memory_space<vmem>>, vector<128x128xf32>
      %c0_7 = arith.constant 0 : index
      %c0_8 = arith.constant 0 : index
      %12 = vector.load %arg5[%c0_7, %c0_8] : memref<128x128xbf16, #tpu.memory_space<vmem>>, vector<128x128xbf16>
      %cst = arith.constant dense<0.000000e+00> : vector<128x128xf32>
      %13 = tpu.matmul %4, %12, %cst {dimension_numbers = #tpu.dot_dimension_numbers<[1], [0], [0], [1], [0, 0, 1, 1], [], []>} : vector<128x128xbf16>, vector<128x128xbf16>, vector<128x128xf32> -> vector<128x128xf32>
      %14 = arith.addf %11, %13 : vector<128x128xf32>
      %c0_9 = arith.constant 0 : index
      %c0_10 = arith.constant 0 : index
      %15 = vector.load %arg13[%c0_9, %c0_10] : memref<128x128xf32, #tpu.memory_space<vmem>>, vector<128x128xf32>
      tpu.vector_store %arg13[%c0_9, %c0_10], %14 {strides = array<i32>} : memref<128x128xf32, #tpu.memory_space<vmem>>, vector<128x128xf32>,
      %c0_i32_11 = arith.constant 0 : i32
      %16 = arith.cmpi eq, %arg2, %c0_i32_11 : i32
      %17 = arith.extui %16 : i1 to i32
      %c0_i32_12 = arith.constant 0 : i32
      %18 = arith.cmpi ne, %17, %c0_i32_12 : i32
      scf.if %18 {
        %c0_13 = arith.constant 0 : index
        %c0_14 = arith.constant 0 : index
        %19 = vector.load %arg13[%c0_13, %c0_14] : memref<128x128xf32, #tpu.memory_space<vmem>>, vector<128x128xf32>
        %c0_15 = arith.constant 0 : index
        %c0_16 = arith.constant 0 : index
        %20 = vector.load %arg4[%c0_15, %c0_16] : memref<128x1xf32, #tpu.memory_space<vmem>>, vector<128x1xf32>
        %21 = vector.broadcast %20 : vector<128x1xf32> to vector<128x128xf32>
        %22 = arith.mulf %19, %21 : vector<128x128xf32>
        %23 = arith.truncf %22 : vector<128x128xf32> to vector<128x128xbf16>
        %c0_17 = arith.constant 0 : index
        %c0_18 = arith.constant 0 : index
        %24 = vector.load %arg7[%c0_17, %c0_18] : memref<128x128xbf16, #tpu.memory_space<vmem>>, vector<128x128xbf16>
        %cst_19 = arith.constant dense<0.000000e+00> : vector<128x128xf32>
        %25 = tpu.matmul %23, %24, %cst_19 {dimension_numbers = #tpu.dot_dimension_numbers<[1], [0], [0], [1], [0, 0, 1, 1], [], []>} : vector<128x128xbf16>, vector<128x128xbf16>, vector<128x128xf32> -> vector<128x128xf32>
        %c0_20 = arith.constant 0 : index
        %c0_21 = arith.constant 0 : index
        %26 = vector.load %arg6[%c0_20, %c0_21] : memref<128x128xbf16, #tpu.memory_space<vmem>>, vector<128x128xbf16>
        %c0_22 = arith.constant 0 : index
        %c0_23 = arith.constant 0 : index
        %27 = vector.load %arg8[%c0_22, %c0_23] : memref<128x128xbf16, #tpu.memory_space<vmem>>, vector<128x128xbf16>
        %cst_24 = arith.constant dense<0.000000e+00> : vector<128x128xf32>
        %28 = tpu.matmul %26, %27, %cst_24 {dimension_numbers = #tpu.dot_dimension_numbers<[1], [0], [0], [1], [0, 0, 1, 1], [], []>} : vector<128x128xbf16>, vector<128x128xbf16>, vector<128x128xf32> -> vector<128x128xf32>
        %29 = arith.addf %25, %28 : vector<128x128xf32>
        %c0_25 = arith.constant 0 : index
        %c0_26 = arith.constant 0 : index
        %30 = vector.load %arg9[%c0_25, %c0_26] : memref<1x128xf32, #tpu.memory_space<vmem>>, vector<1x128xf32>
        %31 = vector.broadcast %30 : vector<1x128xf32> to vector<128x128xf32>
        %32 = arith.addf %29, %31 : vector<128x128xf32>
        %cst_27 = arith.constant 0.000000e+00 : f32
        %33 = vector.broadcast %cst_27 : f32 to vector<128x128xf32>
        %34 = arith.maximumf %32, %33 : vector<128x128xf32>
        %35 = arith.truncf %34 : vector<128x128xf32> to vector<128x128xbf16>
        %c0_28 = arith.constant 0 : index
        %c0_29 = arith.constant 0 : index
        %36 = vector.load %arg10[%c0_28, %c0_29] : memref<128x256xbf16, #tpu.memory_space<vmem>>, vector<128x256xbf16>
        %cst_30 = arith.constant dense<0.000000e+00> : vector<128x256xf32>
        %37 = tpu.matmul %35, %36, %cst_30 {dimension_numbers = #tpu.dot_dimension_numbers<[1], [0], [0], [1], [0, 0, 1, 1], [], []>} : vector<128x128xbf16>, vector<128x256xbf16>, vector<128x256xf32> -> vector<128x256xf32>
        %c128_i32 = arith.constant 128 : i32
        %38 = arith.muli %arg1, %c128_i32 : i32
        %39 = tpu.assume_multiple %38, 128 : i32
        %40 = vector.extract_strided_slice %37 {offsets = [0, 0], sizes = [128, 128], strides = [1, 1]} : vector<128x256xf32> to vector<128x128xf32>
        %41 = arith.truncf %40 : vector<128x128xf32> to vector<128x128xbf16>
        %42 = arith.index_cast %39 : i32 to index
        %c0_31 = arith.constant 0 : index
        %43 = vector.load %arg15[%42, %c0_31] : memref<128x128xbf16, #tpu.memory_space<vmem>>, vector<128x128xbf16>
        tpu.vector_store %arg15[%42, %c0_31], %41 {strides = array<i32>} : memref<128x128xbf16, #tpu.memory_space<vmem>>, vector<128x128xbf16>,
        %44 = vector.extract_strided_slice %37 {offsets = [0, 128], sizes = [128, 128], strides = [1, 1]} : vector<128x256xf32> to vector<128x128xf32>
        %45 = arith.index_cast %39 : i32 to index
        %c0_32 = arith.constant 0 : index
        %46 = vector.load %arg16[%45, %c0_32] : memref<128x128xf32, #tpu.memory_space<vmem>>, vector<128x128xf32>
        tpu.vector_store %arg16[%45, %c0_32], %44 {strides = array<i32>} : memref<128x128xf32, #tpu.memory_space<vmem>>, vector<128x128xf32>,
      } else {
      }
    } else {
    }
    %c1_i32 = arith.constant 1 : i32
    %8 = arith.cmpi eq, %arg0, %c1_i32 : i32
    %9 = arith.extui %8 : i1 to i32
    %c0_i32_4 = arith.constant 0 : i32
    %10 = arith.cmpi ne, %9, %c0_i32_4 : i32
    scf.if %10 {
      %c128_i32 = arith.constant 128 : i32
      %11 = arith.muli %arg2, %c128_i32 : i32
      %12 = tpu.assume_multiple %11, 128 : i32
      %c0_5 = arith.constant 0 : index
      %c0_6 = arith.constant 0 : index
      %13 = vector.load %arg14[%c0_5, %c0_6] : memref<128x128xf32, #tpu.memory_space<vmem>>, vector<128x128xf32>
      %14 = arith.index_cast %12 : i32 to index
      %c0_7 = arith.constant 0 : index
      %15 = vector.load %arg15[%14, %c0_7] : memref<128x128xbf16, #tpu.memory_space<vmem>>, vector<128x128xbf16>
      %cst = arith.constant dense<0.000000e+00> : vector<128x128xf32>
      %16 = tpu.matmul %4, %15, %cst {dimension_numbers = #tpu.dot_dimension_numbers<[1], [0], [0], [1], [0, 0, 1, 1], [], []>} : vector<128x128xbf16>, vector<128x128xbf16>, vector<128x128xf32> -> vector<128x128xf32>
      %17 = arith.addf %13, %16 : vector<128x128xf32>
      %c0_8 = arith.constant 0 : index
      %c0_9 = arith.constant 0 : index
      %18 = vector.load %arg14[%c0_8, %c0_9] : memref<128x128xf32, #tpu.memory_space<vmem>>, vector<128x128xf32>
      tpu.vector_store %arg14[%c0_8, %c0_9], %17 {strides = array<i32>} : memref<128x128xf32, #tpu.memory_space<vmem>>, vector<128x128xf32>,
      %c0_i32_10 = arith.constant 0 : i32
      %19 = arith.cmpi eq, %arg2, %c0_i32_10 : i32
      %20 = arith.extui %19 : i1 to i32
      %c0_i32_11 = arith.constant 0 : i32
      %21 = arith.cmpi ne, %20, %c0_i32_11 : i32
      scf.if %21 {
        %c128_i32_12 = arith.constant 128 : i32
        %22 = arith.muli %arg1, %c128_i32_12 : i32
        %23 = tpu.assume_multiple %22, 128 : i32
        %c0_13 = arith.constant 0 : index
        %c0_14 = arith.constant 0 : index
        %24 = vector.load %arg14[%c0_13, %c0_14] : memref<128x128xf32, #tpu.memory_space<vmem>>, vector<128x128xf32>
        %c0_15 = arith.constant 0 : index
        %c0_16 = arith.constant 0 : index
        %25 = vector.load %arg4[%c0_15, %c0_16] : memref<128x1xf32, #tpu.memory_space<vmem>>, vector<128x1xf32>
        %26 = vector.broadcast %25 : vector<128x1xf32> to vector<128x128xf32>
        %27 = arith.mulf %24, %26 : vector<128x128xf32>
        %28 = arith.index_cast %23 : i32 to index
        %c0_17 = arith.constant 0 : index
        %29 = vector.load %arg16[%28, %c0_17] : memref<128x128xf32, #tpu.memory_space<vmem>>, vector<128x128xf32>
        %30 = arith.addf %27, %29 : vector<128x128xf32>
        %c0_18 = arith.constant 0 : index
        %c0_19 = arith.constant 0 : index
        %31 = vector.load %arg11[%c0_18, %c0_19] : memref<1x128xf32, #tpu.memory_space<vmem>>, vector<1x128xf32>
        %32 = vector.broadcast %31 : vector<1x128xf32> to vector<128x128xf32>
        %33 = arith.addf %30, %32 : vector<128x128xf32>
        %c0_20 = arith.constant 0 : index
        %c0_21 = arith.constant 0 : index
        %34 = vector.load %arg12[%c0_20, %c0_21] : memref<128x128xf32, #tpu.memory_space<vmem>>, vector<128x128xf32>
        tpu.vector_store %arg12[%c0_20, %c0_21], %33 {strides = array<i32>} : memref<128x128xf32, #tpu.memory_space<vmem>>, vector<128x128xf32>,
      } else {
      }
    } else {
    }
    return
  }
  func.func @transform_0(%arg0: i32, %arg1: i32, %arg2: i32) -> (i32, i32) {
    %c0_i32 = arith.constant 0 : i32
    return %arg1, %arg2 : i32, i32
  }
  func.func @transform_1(%arg0: i32, %arg1: i32, %arg2: i32) -> (i32, i32) {
    %c0_i32 = arith.constant 0 : i32
    %c0_i32_0 = arith.constant 0 : i32
    return %arg1, %c0_i32 : i32, i32
  }
  func.func @transform_2(%arg0: i32, %arg1: i32, %arg2: i32) -> (i32, i32) {
    %c1_i32 = arith.constant 1 : i32
    %0 = arith.subi %c1_i32, %arg0 : i32
    %1 = arith.muli %0, %arg2 : i32
    %c0_i32 = arith.constant 0 : i32
    %c0_i32_0 = arith.constant 0 : i32
    return %1, %c0_i32 : i32, i32
  }
  func.func @transform_3(%arg0: i32, %arg1: i32, %arg2: i32) -> (i32, i32) {
    %c1_i32 = arith.constant 1 : i32
    %0 = arith.subi %c1_i32, %arg0 : i32
    %1 = arith.muli %0, %arg1 : i32
    %c0_i32 = arith.constant 0 : i32
    %c0_i32_0 = arith.constant 0 : i32
    return %1, %c0_i32 : i32, i32
  }
  func.func @transform_4(%arg0: i32, %arg1: i32, %arg2: i32) -> (i32, i32) {
    %c0_i32 = arith.constant 0 : i32
    %c0_i32_0 = arith.constant 0 : i32
    %c0_i32_1 = arith.constant 0 : i32
    return %c0_i32, %c0_i32_0 : i32, i32
  }
  func.func @transform_5(%arg0: i32, %arg1: i32, %arg2: i32) -> (i32, i32) {
    %c0_i32 = arith.constant 0 : i32
    %c0_i32_0 = arith.constant 0 : i32
    %c0_i32_1 = arith.constant 0 : i32
    return %c0_i32, %c0_i32_0 : i32, i32
  }
  func.func @transform_6(%arg0: i32, %arg1: i32, %arg2: i32) -> (i32, i32) {
    %c0_i32 = arith.constant 0 : i32
    %c0_i32_0 = arith.constant 0 : i32
    %c0_i32_1 = arith.constant 0 : i32
    return %c0_i32, %c0_i32_0 : i32, i32
  }
  func.func @transform_7(%arg0: i32, %arg1: i32, %arg2: i32) -> (i32, i32) {
    %c0_i32 = arith.constant 0 : i32
    %c0_i32_0 = arith.constant 0 : i32
    %c0_i32_1 = arith.constant 0 : i32
    return %c0_i32, %c0_i32_0 : i32, i32
  }
  func.func @transform_8(%arg0: i32, %arg1: i32, %arg2: i32) -> (i32, i32) {
    %c0_i32 = arith.constant 0 : i32
    %c0_i32_0 = arith.constant 0 : i32
    %c0_i32_1 = arith.constant 0 : i32
    return %c0_i32, %c0_i32_0 : i32, i32
  }
  func.func @transform_9(%arg0: i32, %arg1: i32, %arg2: i32) -> (i32, i32) {
    %0 = arith.muli %arg0, %arg1 : i32
    %c0_i32 = arith.constant 0 : i32
    %c0_i32_0 = arith.constant 0 : i32
    return %0, %c0_i32 : i32, i32
  }
}

</mosaic_0001>

<bundles_post_ra>
// kernel: tpu_custom_call.1
= control target key start
LH: loop header
LB: loop body
LE: loop exit
PB: predicated region body
PF: predicated region fallthrough
CT: control target
= control target key end

     0   :  { %s3557_s0 = inlined_call_operand.hbm [shape: s8[128,128], index: 0, kind: input, shape index: {}]   ;;  %s3558_s1 = inlined_call_operand.hbm [shape: f32[128,1], index: 1, kind: input, shape index: {}]   ;;  %s3559_s2 = inlined_call_operand.hbm [shape: bf16[128,128], index: 2, kind: input, shape index: {}]   ;;  %s3560_s3 = inlined_call_operand.hbm [shape: bf16[128,128], index: 3, kind: input, shape index: {}]   ;;  %s3561_s4 = inlined_call_operand.hbm [shape: bf16[128,128], index: 4, kind: input, shape index: {}]   ;;  %s3562_s5 = inlined_call_operand.hbm [shape: bf16[128,128], index: 5, kind: input, shape index: {}]   ;;  %s3563_s6 = inlined_call_operand.hbm [shape: f32[1,128], index: 6, kind: input, shape index: {}]   ;;  %s3564_s7 = inlined_call_operand.hbm [shape: bf16[128,256], index: 7, kind: input, shape index: {}]   ;;  %s3565_s8 = inlined_call_operand.hbm [shape: f32[1,128], index: 8, kind: input, shape index: {}]   ;;  %s3566_s9 = inlined_call_operand.hbm [shape: f32[128,128], index: 9, kind: output, shape index: {}]  }
   0x1   :  { %3579 = sst [smem:[#allocation28_spill]] %s3557_s0 }
   0x2   :  { %3580 = sst [smem:[#allocation29_spill]] %s3558_s1 }
   0x3   :  { %3581 = sst [smem:[#allocation30_spill]] %s3562_s5 }
   0x4   :  { %3582 = sst [smem:[#allocation31_spill]] %s3564_s7 }
   0x5   :  { %14 = vsyncpa [#allocation7], 0 }
   0x6   :  { %15 = vsyncpa [#allocation10], 0 }
   0x7   :  { %16 = vsyncpa [#allocation15], 0 }
   0x8   :  { %17 = vsyncpa [#allocation18], 0 }
   0x9   :  { %18 = vsyncpa [#allocation8], 0 }
   0xa   :  { %20 = vsyncpa [#allocation8 + $0x1], 0  ;;  %s3107_s30 = smov 0   ;;  %s3109_s10 = smov 0  }
   0xb   :  { %s3111_s11 = smov 0  }
   0xc LB: > { %s3123_s12 = sadd.s32 4294967295, %s3036_s11   ;;  %s45_s14 = sadd.s32 1, %s3032_s10  ;;  %s3036_s11 = sphi %s3111_s11, %s26_s11   ;;  %s3032_s10 = sphi %s3109_s10, %s3614_s10   ;;  %s3028_s30 = sphi %s3107_s30, %s3613_s30  }
   0xd   : > { %p2193_p0 = scmp.ge.s32.totalorder %s3036_s11, 1  ;;  %p47_p1 = scmp.ge.s32.totalorder %s45_s14, 2 }
   0xe   : > { %p297_p2 = scmp.lt.s32.totalorder %s3036_s11, 3  ;;  %p3567_p3 = scmp.eq.s32.totalorder %s3123_s12, 0 }
   0xf   : > { %s3616_s14 = smov (%p47_p1, %s45_s14), 0  ;;  %s3038_s16 = smov [#allocation6]  }
  0x10   : > { %p3132_p4 = pnand %p2193_p0, %p297_p2  ;;  %s313_s17 = sshll.u32 %s3038_s16, 4  ;;  %s314_s17 = int_to_ptr.vmem [resolvable:$true] %s313_s17 }
  0x11   : > { %s3039_s19 = smov [#allocation9]   ;;  %s3585_s0 = sld [smem:[#allocation28_spill]] }
  0x12   : > { %s3583_s15 = scalar_select %p3132_p4, 1, 0 }
  0x13   : > { %p2550_p5 = pneg %p3132_p4  ;;  %s329_s20 = sshll.u32 %s3039_s19, 4  ;;  %s330_s20 = int_to_ptr.vmem [resolvable:$true] %s329_s20 }
  0x15   : > { %p3141_p7 = pnand %p3567_p3, %p2550_p5 }
  0x17   : > { %s3584_s18 = scalar_select %p3141_p7, 1, 0 }
  0x18   : > { %s2708_s23 = scalar_lea.hbm %s3585_s0, 512  ;;  %p3153_p9 = pneg %p3141_p7 }
  0x19   : > { %p2709_p8 = scmp.ne.s32.totalorder %s3585_s0, %s2708_s23  ;;  %p2715_p12 = scmp.lt.u32.totalorder %s2708_s23, %s3585_s0 }
  0x1a   : > { %s3586_s26 = scalar_select %p3153_p9, 1, 0 }
  0x1b   : > { %p2711_p10 = pnand %p3153_p9, %p2709_p8 }
  0x1d   : > { %p2712_p11 = pneg %p2711_p10 }
  0x1f   : > { %p2717_p13 = pnand %p2715_p12, %p2712_p11 }
  0x21   : > { %2720 = shalt.err (!%p2717_p13)
}
  0x22   : > { %s2721_s29 = scalar_lea.vmem %s314_s17, 512  ;;  %p2729_p5 = scmp.lt.s32.totalorder %s314_s17, %s314_s17 }
  0x23   : > { %p2722_p0 = scmp.ne.s32.totalorder %s314_s17, %s2721_s29  ;;  %p2730_p6 = scmp.lt.s32.totalorder %s2721_s29, %s2721_s29 }
  0x25   : > { %p2724_p1 = pnand %p2722_p0, %p3153_p9  ;;  %p2731_p3 = por %p2730_p6, %p2729_p5 }
  0x27   : > { %p2725_p2 = pneg %p2724_p1 }
  0x29   : > { %p2732_p4 = pnand %p2731_p3, %p2725_p2 }
  0x2b   : > { %2735 = shalt.err (!%p2732_p4)
}
  0x2c   : > { %s3569_s16 = smov 128   ;;  %s3041_s19 = smov 8  }
  0x2d   : > { %2553 = dma.hbm_to_vmem [thread:$0]  (!%p3141_p7), %s3585_s0, 512, %s314_s17, [#allocation7], %s3569_s16, %s3569_s16, %s3041_s19  }
  0x2e   : > { %s3587_s1 = sld [smem:[#allocation29_spill]] }
  0x34   : > { %s2736_s25 = scalar_lea.hbm %s3587_s1, 2048 }
  0x35   : > { %p2737_p3 = scmp.ne.s32.totalorder %s3587_s1, %s2736_s25  ;;  %p2743_p8 = scmp.lt.u32.totalorder %s2736_s25, %s3587_s1 }
  0x37   : > { %p2739_p4 = pnand %p2737_p3, %p3153_p9 }
  0x39   : > { %p2740_p6 = pneg %p2739_p4 }
  0x3b   : > { %p2745_p10 = pnand %p2743_p8, %p2740_p6 }
  0x3d   : > { %2748 = shalt.err (!%p2745_p10)
}
  0x3e   : > { %s2749_s21 = scalar_lea.vmem %s330_s20, 2048  ;;  %p2757_p0 = scmp.lt.s32.totalorder %s330_s20, %s330_s20 }
  0x3f   : > { %p2750_p11 = scmp.ne.s32.totalorder %s330_s20, %s2749_s21  ;;  %p2758_p1 = scmp.lt.s32.totalorder %s2749_s21, %s2749_s21 }
  0x41   : > { %p2752_p12 = pnand %p2750_p11, %p3153_p9  ;;  %p2759_p2 = por %p2758_p1, %p2757_p0 }
  0x43   : > { %p2753_p13 = pneg %p2752_p12 }
  0x45   : > { %p2760_p5 = pnand %p2759_p2, %p2753_p13 }
  0x47   : > { %2763 = shalt.err (!%p2760_p5)
}
  0x48   : > { %2556 = dma.hbm_to_vmem [thread:$0]  (!%p3141_p7), %s3587_s1, 2048, %s330_s20, [#allocation10], %s3569_s16, %s3569_s16, %s3041_s19  }
  0x49   : > { %s3042_s22 = smov [#allocation14]   ;;  %s3043_s24 = smov [#allocation17]  }
  0x4a   : > { %s355_s23 = sshll.u32 %s3042_s22, 4  ;;  %s379_s25 = sshll.u32 %s3043_s24, 4  ;;  %s356_s23 = int_to_ptr.vmem [resolvable:$true] %s355_s23  ;;  %s3193_s25 = int_to_ptr.vmem [resolvable:$true] %s379_s25 }
  0x4b   : > { %s3588_s5 = sld [smem:[#allocation30_spill]] }
  0x51   : > { %s2764_s29 = scalar_lea.hbm %s3588_s5, 1024 }
  0x52   : > { %p2765_p3 = scmp.ne.s32.totalorder %s3588_s5, %s2764_s29  ;;  %p2771_p8 = scmp.lt.u32.totalorder %s2764_s29, %s3588_s5 }
  0x54   : > { %p2767_p4 = pnand %p2765_p3, %p3153_p9 }
  0x56   : > { %p2768_p6 = pneg %p2767_p4 }
  0x58   : > { %p2773_p10 = pnand %p2771_p8, %p2768_p6 }
  0x5a   : > { %2776 = shalt.err (!%p2773_p10)
}
  0x5b   : > { %s2777_s17 = scalar_lea.vmem %s356_s23, 1024  ;;  %p2785_p0 = scmp.lt.s32.totalorder %s356_s23, %s356_s23 }
  0x5c   : > { %p2778_p11 = scmp.ne.s32.totalorder %s356_s23, %s2777_s17  ;;  %p2786_p1 = scmp.lt.s32.totalorder %s2777_s17, %s2777_s17 }
  0x5e   : > { %p2780_p12 = pnand %p2778_p11, %p3153_p9  ;;  %p2787_p2 = por %p2786_p1, %p2785_p0 }
  0x60   : > { %p2781_p13 = pneg %p2780_p12 }
  0x62   : > { %p2788_p5 = pnand %p2787_p2, %p2781_p13 }
  0x64   : > { %2791 = shalt.err (!%p2788_p5)
}
  0x65   : > { %s3570_s0 = smov 64   ;;  %s3045_s22 = smov 4  }
  0x66   : > { %2562 = dma.hbm_to_vmem [thread:$0]  (!%p3141_p7), %s3588_s5, 1024, %s356_s23, [#allocation15], %s3570_s0, %s3570_s0, %s3045_s22  }
  0x67   : > { %s3589_s7 = sld [smem:[#allocation31_spill]] }
  0x6d   : > { %s2792_s21 = scalar_lea.hbm %s3589_s7, 2048 }
  0x6e   : > { %p2793_p3 = scmp.ne.s32.totalorder %s3589_s7, %s2792_s21  ;;  %p2799_p8 = scmp.lt.u32.totalorder %s2792_s21, %s3589_s7 }
  0x70   : > { %p2795_p4 = pnand %p2793_p3, %p3153_p9 }
  0x72   : > { %p2796_p6 = pneg %p2795_p4 }
  0x74   : > { %p2801_p10 = pnand %p2799_p8, %p2796_p6 }
  0x76   : > { %2804 = shalt.err (!%p2801_p10)
}
  0x77   : > { %s2805_s23 = scalar_lea.vmem %s3193_s25, 2048  ;;  %p2813_p0 = scmp.lt.s32.totalorder %s3193_s25, %s3193_s25 }
  0x78   : > { %p2806_p11 = scmp.ne.s32.totalorder %s3193_s25, %s2805_s23  ;;  %p2814_p1 = scmp.lt.s32.totalorder %s2805_s23, %s2805_s23 }
  0x7a   : > { %p2808_p12 = pnand %p2806_p11, %p3153_p9  ;;  %p2815_p2 = por %p2814_p1, %p2813_p0 }
  0x7c   : > { %p2809_p13 = pneg %p2808_p12 }
  0x7e   : > { %p2816_p5 = pnand %p2815_p2, %p2809_p13 }
  0x80   : > { %2819 = shalt.err (!%p2816_p5)
}
  0x81   : > { %s3590_s16 = smov 128   ;;  %p2590_p3 = scmp.lt.s32.totalorder %s3036_s11, 2 }
  0x82   : > { %2568 = dma.hbm_to_vmem [thread:$0]  (!%p3141_p7), %s3589_s7, 2048, %s3193_s25, [#allocation18], %s3590_s16, %s3590_s16, %s3041_s19  }
  0x83   : > { %p2591_p4 = scmp.eq.s32.totalorder %s3036_s11, 0  ;;  %s404_s28 = sand.u32 1, %s3036_s11  }
  0x84   : > { %s3046_s29 = smov [#allocation11]   ;;  %s3047_s20 = smov [#allocation13]  }
  0x85   : > { %s417_s21 = sshll.u32 %s3046_s29, 4  ;;  %p3245_p6 = pnand %p2591_p4, %p2590_p3  ;;  %s418_s21 = int_to_ptr.vmem [resolvable:$true] %s417_s21 }
  0x86   : > { %s342_s17 = sshll.u32 %s3047_s20, 4  ;;  %s3249_s23 = scalar_lea.sflag [#allocation7], %s404_s28  ;;  %s343_s17 = int_to_ptr.vmem [resolvable:$true] %s342_s17 }
  0x87   : > { %s3591_s13 = scalar_select %p3245_p6, 1, 0 }
  0x88   : > { %s2820_s19 = scalar_lea.hbm %s3559_s2, 1024  ;;  %p3576_p10 = pneg %p3245_p6 }
  0x89   : > { %p2821_p8 = scmp.ne.s32.totalorder %s3559_s2, %s2820_s19  ;;  %p2827_p13 = scmp.lt.u32.totalorder %s2820_s19, %s3559_s2 }
  0x8b   : > { %p2823_p11 = pnand %p3576_p10, %p2821_p8 }
  0x8d   : > { %p2824_p12 = pneg %p2823_p11 }
  0x8f   : > { %p2829_p0 = pnand %p2827_p13, %p2824_p12 }
  0x91   : > { %2832 = shalt.err (!%p2829_p0)
}
  0x92   : > { %s2833_s28 = scalar_lea.vmem %s418_s21, 1024  ;;  %s2840_s20 = scalar_lea.vmem %s418_s21, 2048 }
  0x93   : > { %p2834_p1 = scmp.ne.s32.totalorder %s418_s21, %s2833_s28  ;;  %p2841_p3 = scmp.lt.s32.totalorder %s418_s21, %s418_s21 }
  0x94   : > { %p2842_p4 = scmp.lt.s32.totalorder %s2840_s20, %s2833_s28 }
  0x95   : > { %p2836_p2 = pnand %p2834_p1, %p3576_p10 }
  0x96   : > { %p2843_p7 = por %p2842_p4, %p2841_p3 }
  0x97   : > { %p2837_p5 = pneg %p2836_p2 }
  0x99   : > { %p2844_p9 = pnand %p2843_p7, %p2837_p5 }
  0x9b   : > { %2847 = shalt.err (!%p2844_p9)
}
  0x9c   : > { %s3592_s0 = smov 64   ;;  %s3048_s19 = smov [#allocation16]  }
  0x9d   : > { %2575 = dma.hbm_to_vmem [thread:$0]  (!%p3245_p6), %s3559_s2, 1024, %s418_s21, %s3249_s23, %s3592_s0, %s3592_s0, %s3045_s22  }
  0x9e   : > { %s369_s25 = sshll.u32 %s3048_s19, 4  ;;  %s2848_s28 = scalar_lea.hbm %s3561_s4, 1024  ;;  %s370_s25 = int_to_ptr.vmem [resolvable:$true] %s369_s25 }
  0x9f   : > { %p2849_p7 = scmp.ne.s32.totalorder %s3561_s4, %s2848_s28  ;;  %p3593_p9 = scmp.ne.s32.totalorder %s3586_s26, 0 }
  0xa0   : > { %p2855_p12 = scmp.lt.u32.totalorder %s2848_s28, %s3561_s4 }
  0xa1   : > { %p2851_p8 = pnand %p2849_p7, %p3593_p9 }
  0xa3   : > { %p2852_p11 = pneg %p2851_p8 }
  0xa5   : > { %p2857_p13 = pnand %p2855_p12, %p2852_p11 }
  0xa7   : > { %2860 = shalt.err (!%p2857_p13)
}
  0xa8   : > { %s2861_s21 = scalar_lea.vmem %s343_s17, 1024  ;;  %p2869_p5 = scmp.lt.s32.totalorder %s343_s17, %s343_s17 }
  0xa9   : > { %p2862_p0 = scmp.ne.s32.totalorder %s343_s17, %s2861_s21  ;;  %p2870_p3 = scmp.lt.s32.totalorder %s2861_s21, %s2861_s21 }
  0xab   : > { %p2864_p1 = pnand %p2862_p0, %p3593_p9  ;;  %p2871_p4 = por %p2870_p3, %p2869_p5 }
  0xad   : > { %p2865_p2 = pneg %p2864_p1 }
  0xaf   : > { %p2872_p10 = pnand %p2871_p4, %p2865_p2 }
  0xb1   : > { %2875 = shalt.err (!%p2872_p10)
}
  0xb2   : > { %p3594_p7 = scmp.ne.s32.totalorder %s3584_s18, 0  ;;  %s2876_s27 = scalar_lea.hbm %s3563_s6, 16 }
  0xb3   : > { %p2877_p8 = scmp.ne.s32.totalorder %s3563_s6, %s2876_s27  ;;  %p2883_p12 = scmp.lt.u32.totalorder %s2876_s27, %s3563_s6 }
  0xb4   : > { %2559 = dma.hbm_to_vmem [thread:$0]  (!%p3594_p7), %s3561_s4, 1024, %s343_s17, [#allocation10], %s3592_s0, %s3592_s0, %s3045_s22  }
  0xb5   : > { %p2879_p10 = pnand %p2877_p8, %p3593_p9 }
  0xb7   : > { %p2880_p11 = pneg %p2879_p10 }
  0xb9   : > { %p2885_p13 = pnand %p2883_p12, %p2880_p11 }
  0xbb   : > { %2888 = shalt.err (!%p2885_p13)
}
  0xbc   : > { %s2889_s20 = scalar_lea.vmem %s370_s25, 16  ;;  %s2896_s17 = scalar_lea.vmem %s370_s25, 32 }
  0xbd   : > { %p2890_p0 = scmp.ne.s32.totalorder %s370_s25, %s2889_s20  ;;  %p2897_p5 = scmp.lt.s32.totalorder %s370_s25, %s370_s25 }
  0xbe   : > { %p2898_p3 = scmp.lt.s32.totalorder %s2896_s17, %s2889_s20 }
  0xbf   : > { %p2892_p1 = pnand %p2890_p0, %p3593_p9 }
  0xc0   : > { %p2899_p4 = por %p2898_p3, %p2897_p5 }
  0xc1   : > { %p2893_p2 = pneg %p2892_p1 }
  0xc3   : > { %p2900_p6 = pnand %p2899_p4, %p2893_p2 }
  0xc5   : > { %2903 = shalt.err (!%p2900_p6)
}
  0xc6   : > { %2565 = dma.hbm_to_vmem [thread:$0]  (!%p3594_p7), %s3563_s6, 16, %s370_s25, [#allocation15]  }
  0xc7   : > { %s3049_s5 = smov [#allocation19]   ;;  %s3050_s24 = smov [#allocation12]  }
  0xc8   : > { %s393_s7 = sshll.u32 %s3049_s5, 4  ;;  %s440_s27 = sshll.u32 %s3050_s24, 4  ;;  %s394_s7 = int_to_ptr.vmem [resolvable:$true] %s393_s7  ;;  %s441_s27 = int_to_ptr.vmem [resolvable:$true] %s440_s27 }
  0xc9   : > { %s2904_s29 = scalar_lea.hbm %s3565_s8, 16 }
  0xca   : > { %p2905_p6 = scmp.ne.s32.totalorder %s3565_s8, %s2904_s29  ;;  %p2911_p11 = scmp.lt.u32.totalorder %s2904_s29, %s3565_s8 }
  0xcc   : > { %p2907_p8 = pnand %p2905_p6, %p3593_p9 }
  0xce   : > { %p2908_p10 = pneg %p2907_p8 }
  0xd0   : > { %p2913_p12 = pnand %p2911_p11, %p2908_p10 }
  0xd2   : > { %2916 = shalt.err (!%p2913_p12)
}
  0xd3   : > { %s2917_s25 = scalar_lea.vmem %s394_s7, 16  ;;  %s2924_s1 = scalar_lea.vmem %s394_s7, 32 }
  0xd4   : > { %p2918_p13 = scmp.ne.s32.totalorder %s394_s7, %s2917_s25  ;;  %p2925_p2 = scmp.lt.s32.totalorder %s394_s7, %s394_s7 }
  0xd5   : > { %p2926_p5 = scmp.lt.s32.totalorder %s2924_s1, %s2917_s25 }
  0xd6   : > { %p2920_p0 = pnand %p2918_p13, %p3593_p9 }
  0xd7   : > { %p2927_p3 = por %p2926_p5, %p2925_p2 }
  0xd8   : > { %p2921_p1 = pneg %p2920_p0 }
  0xda   : > { %p2928_p4 = pnand %p2927_p3, %p2921_p1 }
  0xdc   : > { %2931 = shalt.err (!%p2928_p4)
}
  0xdd   : > { %2571 = dma.hbm_to_vmem [thread:$0]  (!%p3594_p7), %s3565_s8, 16, %s394_s7, [#allocation18]  }
  0xde   : > { %s2932_s26 = scalar_lea.hbm %s3560_s3, 1024  ;;  %p3595_p6 = scmp.ne.s32.totalorder %s3591_s13, 0 }
  0xdf   : > { %p2933_p9 = scmp.ne.s32.totalorder %s3560_s3, %s2932_s26  ;;  %p2939_p12 = scmp.lt.u32.totalorder %s2932_s26, %s3560_s3 }
  0xe0   : > { %p3596_p8 = pneg %p3595_p6 }
  0xe2   : > { %p2935_p10 = pnand %p2933_p9, %p3596_p8 }
  0xe4   : > { %p2936_p11 = pneg %p2935_p10 }
  0xe6   : > { %p2941_p13 = pnand %p2939_p12, %p2936_p11 }
  0xe8   : > { %2944 = shalt.err (!%p2941_p13)
}
  0xe9   : > { %s2945_s7 = scalar_lea.vmem %s441_s27, 1024  ;;  %p3597_p0 = pmov %p3596_p8 }
  0xea   : > { %p2946_p7 = scmp.ne.s32.totalorder %s441_s27, %s2945_s7  ;;  %s2952_s17 = scalar_lea.vmem %s441_s27, 2048 }
  0xeb   : > { %p2953_p5 = scmp.lt.s32.totalorder %s441_s27, %s441_s27  ;;  %p2954_p3 = scmp.lt.s32.totalorder %s2952_s17, %s2945_s7 }
  0xec   : > { %p2948_p1 = pnand %p2946_p7, %p3597_p0 }
  0xed   : > { %p2955_p4 = por %p2954_p3, %p2953_p5 }
  0xee   : > { %p2949_p2 = pneg %p2948_p1 }
  0xf0   : > { %p2956_p8 = pnand %p2955_p4, %p2949_p2 }
  0xf2   : > { %2959 = shalt.err (!%p2956_p8)
}
  0xf3   : > { %2578 = dma.hbm_to_vmem [thread:$0]  (!%p3595_p6), %s3560_s3, 1024, %s441_s27, %s3249_s23, %s3592_s0, %s3592_s0, %s3045_s22  }
  0xf4   : > { %p3598_p9 = scmp.ne.s32.totalorder %s3583_s15, 0 }
  0xf5   : > { %p3599_p10 = scmp.eq.s32.totalorder (!%p3598_p9), %s3123_s12, 0 }
  0xf6   : > { %452 = sbr.rel (%p3598_p9) target bundleno = 1296 (0x510), region = 56 }
  0xfd   : > { %2999 = dma.done.wait (%p3599_p10), [#allocation7], 512   ;;  %p3600_p11 = pmov %p3599_p10 }
  0xfe   : > { %p3601_p12 = pmov %p3599_p10 }
  0xff   : > { %3001 = vsyncadd (%p3600_p11), [#allocation7], 4294966784 }
 0x100   : > { %3003 = dma.done.wait (%p3601_p12), [#allocation10], 2048   ;;  %p3602_p13 = pmov %p3599_p10 }
 0x101   : > { %s462_s13 = sand.u32 1, %s3123_s12   ;;  %p3603_p6 = pmov %p3599_p10 }
 0x102   : > { %3005 = vsyncadd (%p3602_p13), [#allocation10], 4294965248  ;;  %s463_s1 = scalar_lea.sflag [#allocation7], %s462_s13 }
 0x103   : > { %3007 = dma.done.wait (%p3603_p6), %s463_s1, 2048   ;;  %p3604_p7 = pmov %p3603_p6 }
 0x104   : > { %p3605_p0 = pmov %p3603_p6 }
 0x105   : > { %3009 = vsyncadd (%p3604_p7), %s463_s1, 4294965248 }
 0x106   : > { %3011 = dma.done.wait (%p3605_p0), [#allocation10], 1024   ;;  %p3606_p1 = pmov %p3605_p0 }
 0x107   : > { %p3607_p2 = pmov %p3605_p0 }
 0x108   : > { %3013 = vsyncadd (%p3606_p1), [#allocation10], 4294966272 }
 0x109   : > { %3015 = dma.done.wait (%p3607_p2), [#allocation15], 1040   ;;  %p3608_p5 = pmov %p3605_p0 }
 0x10a   : > { %p3609_p3 = pmov %p3605_p0 }
 0x10b   : > { %3017 = vsyncadd (%p3608_p5), [#allocation15], 4294966256 }
 0x10c   : > { %3019 = dma.done.wait (%p3609_p3), [#allocation18], 2064   ;;  %p3610_p4 = pmov %p3605_p0 }
 0x10d   : > { %v3051_v0 = vmov 0.0   ;;  %v3385_v1 = vld [vmem:[#allocation6] sm:$0xff]  ;;  %v3387_v2 = vld [vmem:[#allocation6 + $0x8] sm:$0xff]  ;;  %v3389_v3 = vld [vmem:[#allocation6 + $0x10] sm:$0xff]  ;;  %p2214_p8 = scmp.ne.s32.totalorder %s3028_s30, 0 }
 0x10e   : > { %3021 = vsyncadd (%p3610_p4), [#allocation18], 4294965232  ;;  %550 = vst [vmem:[#allocation2] sm:$0xff] %v3051_v0  ;;  %v3391_v4 = vld [vmem:[#allocation6 + $0x18] sm:$0xff]  ;;  %v586_v5 = vunpack.c.l.s8.bf16 %v3385_v1  ;;  %v587_v6 = vunpack.c.h.s8.bf16 %v3385_v1  ;;  %v588_v7 = vunpack.c.l.s8.bf16 %v3387_v2  ;;  %v589_v8 = vunpack.c.h.s8.bf16 %v3387_v2  ;;  %v2650_v13 = vld [vmem:[#allocation11] sm:$0xff] (!%p2214_p8)  }
 0x10f   : > { %551 = vst [vmem:[#allocation2 + $0x8] sm:$0xff] %v3051_v0  ;;  %552 = vst [vmem:[#allocation2 + $0x10] sm:$0xff] %v3051_v0  ;;  %v590_v9 = vunpack.c.l.s8.bf16 %v3389_v3  ;;  %v591_v10 = vunpack.c.h.s8.bf16 %v3389_v3  ;;  %v592_v11 = vunpack.c.l.s8.bf16 %v3391_v4  ;;  %v593_v12 = vunpack.c.h.s8.bf16 %v3391_v4  ;;  %v2651_v14 = vld [vmem:[#allocation11 + $0x8] sm:$0xff] (!%p2214_p8)   ;;  %2334 = vmatprep.subr.bf16.mxu0 (!%p2214_p8), %v2650_v13  ;;  %v2652_v16 = vld [vmem:[#allocation11 + $0x10] sm:$0xff] (!%p2214_p8)  }
 0x110   : > { %553 = vst [vmem:[#allocation2 + $0x18] sm:$0xff] %v3051_v0  ;;  %554 = vst [vmem:[#allocation2 + $0x20] sm:$0xff] %v3051_v0  ;;  %2350 = vmatprep.mubr.bf16.mxu0 (!%p2214_p8), %v586_v5  ;;  %v3052_v15 = vmov (!%p2214_p8), 0   ;;  %2335 = vmatpush3.bf16.msra.mxu0 (!%p2214_p8), %v2650_v13  ;;  %v2653_v17 = vld [vmem:[#allocation11 + $0x18] sm:$0xff] (!%p2214_p8)   ;;  %v826_v18 = vld [vmem:[#allocation9] sm:$0xff] (!%p2214_p8) }
 0x111   : > { %555 = vst [vmem:[#allocation2 + $0x28] sm:$0xff] %v3051_v0  ;;  %556 = vst [vmem:[#allocation2 + $0x30] sm:$0xff] %v3051_v0  ;;  %2648 = vset.pattern.permute.xlu0 (!%p2214_p8), %v3052_v15  ;;  %2649 = vset.pattern.permute.xlu1 (!%p2214_p8), %v3052_v15  ;;  %v828_v19 = vld [vmem:[#allocation9 + $0x10] sm:$0xff] (!%p2214_p8)  ;;  %v827_v20 = vld [vmem:[#allocation9 + $0x8] sm:$0xff] (!%p2214_p8) }
 0x112   : > { %557 = vst [vmem:[#allocation2 + $0x38] sm:$0xff] %v3051_v0  ;;  %558 = vst [vmem:[#allocation2 + $0x40] sm:$0xff] %v3051_v0  ;;  %2336 = vmatprep.subr.bf16.mxu0 (!%p2214_p8), %v2651_v14  ;;  %844 = vperm.xlu0 (!%p2214_p8), %2648, %v826_v18   ;;  %v829_v21 = vld [vmem:[#allocation9 + $0x18] sm:$0xff] (!%p2214_p8)  ;;  %v2654_v22 = vld [vmem:[#allocation11 + $0x20] sm:$0xff] (!%p2214_p8)  }
 0x113   : > { %559 = vst [vmem:[#allocation2 + $0x48] sm:$0xff] %v3051_v0  ;;  %560 = vst [vmem:[#allocation2 + $0x50] sm:$0xff] %v3051_v0  ;;  %854 = vperm.xlu1 (!%p2214_p8), %2649, %v828_v19   ;;  %v830_v23 = vld [vmem:[#allocation9 + $0x20] sm:$0xff] (!%p2214_p8)  ;;  %v831_v24 = vld [vmem:[#allocation9 + $0x28] sm:$0xff] (!%p2214_p8) }
 0x114   : > { %561 = vst [vmem:[#allocation2 + $0x58] sm:$0xff] %v3051_v0  ;;  %562 = vst [vmem:[#allocation2 + $0x60] sm:$0xff] %v3051_v0  ;;  %2337 = vmatpush3.bf16.msra.mxu0 (!%p2214_p8), %v2651_v14  ;;  %v2658_v25 = vld [vmem:[#allocation14] sm:$0xff] (!%p2214_p8)   ;;  %v2659_v26 = vld [vmem:[#allocation14 + $0x8] sm:$0xff] (!%p2214_p8)  }
 0x115   : > { %563 = vst [vmem:[#allocation2 + $0x68] sm:$0xff] %v3051_v0  ;;  %564 = vst [vmem:[#allocation2 + $0x70] sm:$0xff] %v3051_v0  ;;  %2338 = vmatprep.subr.bf16.mxu0 (!%p2214_p8), %v2652_v16  ;;  %v2655_v27 = vld [vmem:[#allocation11 + $0x28] sm:$0xff] (!%p2214_p8)   ;;  %2366 = vmatprep.subr.bf16.mxu1 (!%p2214_p8), %v2658_v25  ;;  %v832_v28 = vld [vmem:[#allocation9 + $0x30] sm:$0xff] (!%p2214_p8) }
 0x116   : > { %565 = vst [vmem:[#allocation2 + $0x78] sm:$0xff] %v3051_v0  ;;  %566 = vst [vmem:[#allocation3] sm:$0xff] %v3051_v0  ;;  %849 = vperm.xlu0 (!%p2214_p8), %2648, %v827_v20   ;;  %v2656_v29 = vld [vmem:[#allocation11 + $0x30] sm:$0xff] (!%p2214_p8)   ;;  %v833_v30 = vld [vmem:[#allocation9 + $0x38] sm:$0xff] (!%p2214_p8)  ;;  %2367 = vmatpush3.bf16.msra.mxu1 (!%p2214_p8), %v2658_v25 }
 0x117   : > { %567 = vst [vmem:[#allocation3 + $0x8] sm:$0xff] %v3051_v0  ;;  %568 = vst [vmem:[#allocation3 + $0x10] sm:$0xff] %v3051_v0  ;;  %859 = vperm.xlu1 (!%p2214_p8), %2649, %v829_v21   ;;  %2368 = vmatprep.subr.bf16.mxu1 (!%p2214_p8), %v2659_v26  ;;  %v2660_v31 = vld [vmem:[#allocation14 + $0x10] sm:$0xff] (!%p2214_p8)   ;;  %v834_v32 = vld [vmem:[#allocation9 + $0x40] sm:$0xff] (!%p2214_p8) }
 0x118   : > { %569 = vst [vmem:[#allocation3 + $0x18] sm:$0xff] %v3051_v0  ;;  %570 = vst [vmem:[#allocation3 + $0x20] sm:$0xff] %v3051_v0  ;;  %597 = sbr.rel (%p2214_p8) target bundleno = 1003 (0x3eb), region = 100  ;;  %2339 = vmatpush3.bf16.msra.mxu0 (!%p2214_p8), %v2652_v16  ;;  %v835_v33 = vld [vmem:[#allocation9 + $0x48] sm:$0xff] (!%p2214_p8)  ;;  %v2666_v34 = vld [vmem:[#allocation12] sm:$0xff] (!%p2214_p8)  }
 0x119   : > { %571 = vst [vmem:[#allocation3 + $0x28] sm:$0xff] %v3051_v0  ;;  %572 = vst [vmem:[#allocation3 + $0x30] sm:$0xff] %v3051_v0  ;;  %2340 = vmatprep.subr.bf16.mxu0 (!%p2214_p8), %v2653_v17  ;;  %v2661_v35 = vld [vmem:[#allocation14 + $0x18] sm:$0xff] (!%p2214_p8)   ;;  %2382 = vmatprep.mubr.bf16.mxu1 (!%p2214_p8), %v2666_v34  ;;  %v836_v37 = vld [vmem:[#allocation9 + $0x50] sm:$0xff] (!%p2214_p8) }
 0x11a   : > { %573 = vst [vmem:[#allocation3 + $0x38] sm:$0xff] %v3051_v0  ;;  %574 = vst [vmem:[#allocation3 + $0x40] sm:$0xff] %v3051_v0  ;;  %864 = vperm.xlu0 (!%p2214_p8), %2648, %v830_v23   ;;  %2369 = vmatpush3.bf16.msra.mxu1 (!%p2214_p8), %v2659_v26  ;;  %v2657_v36 = vld [vmem:[#allocation11 + $0x38] sm:$0xff] (!%p2214_p8)   ;;  %v2662_v39 = vld [vmem:[#allocation14 + $0x20] sm:$0xff] (!%p2214_p8)  }
 0x11b   : > { %575 = vst [vmem:[#allocation3 + $0x48] sm:$0xff] %v3051_v0  ;;  %576 = vst [vmem:[#allocation3 + $0x50] sm:$0xff] %v3051_v0  ;;  %869 = vperm.xlu1 (!%p2214_p8), %2649, %v831_v24   ;;  %2370 = vmatprep.subr.bf16.mxu1 (!%p2214_p8), %v2660_v31  ;;  %v837_v38 = vld [vmem:[#allocation9 + $0x58] sm:$0xff] (!%p2214_p8)  ;;  %v838_v40 = vld [vmem:[#allocation9 + $0x60] sm:$0xff] (!%p2214_p8) }
 0x11c   : > { %577 = vst [vmem:[#allocation3 + $0x58] sm:$0xff] %v3051_v0  ;;  %578 = vst [vmem:[#allocation3 + $0x60] sm:$0xff] %v3051_v0  ;;  %2341 = vmatpush3.bf16.msra.mxu0 (!%p2214_p8), %v2653_v17  ;;  %v839_v41 = vld [vmem:[#allocation9 + $0x68] sm:$0xff] (!%p2214_p8)  ;;  %v840_v43 = vld [vmem:[#allocation9 + $0x70] sm:$0xff] (!%p2214_p8) }
 0x11d   : > { %579 = vst [vmem:[#allocation3 + $0x68] sm:$0xff] %v3051_v0  ;;  %580 = vst [vmem:[#allocation3 + $0x70] sm:$0xff] %v3051_v0  ;;  %2342 = vmatprep.subr.bf16.mxu0 (!%p2214_p8), %v2654_v22  ;;  %v2663_v42 = vld [vmem:[#allocation14 + $0x28] sm:$0xff] (!%p2214_p8)   ;;  %v841_v44 = vld [vmem:[#allocation9 + $0x78] sm:$0xff] (!%p2214_p8) }
 0x11e   : > { %581 = vst [vmem:[#allocation3 + $0x78] sm:$0xff] %v3051_v0  ;;  %874 = vperm.xlu0 (!%p2214_p8), %2648, %v832_v28   ;;  %2371 = vmatpush3.bf16.msra.mxu1 (!%p2214_p8), %v2660_v31  ;;  %v2664_v45 = vld [vmem:[#allocation14 + $0x30] sm:$0xff] (!%p2214_p8)   ;;  %v2665_v46 = vld [vmem:[#allocation14 + $0x38] sm:$0xff] (!%p2214_p8)   ;;  %v2667_v47 = vld [vmem:[#allocation13] sm:$0xff] (!%p2214_p8)  }
 0x11f   : > { %879 = vperm.xlu1 %2649, %v833_v30   ;;  %2372 = vmatprep.subr.bf16.mxu1 %v2661_v35  ;;  %v2668_v48 = vld [vmem:[#allocation12 + $0x8] sm:$0xff]   ;;  %v2670_v50 = vld [vmem:[#allocation12 + $0x10] sm:$0xff]   ;;  %v2672_v52 = vld [vmem:[#allocation12 + $0x18] sm:$0xff]  }
 0x120   : > { %2343 = vmatpush3.bf16.msra.mxu0 %v2654_v22  ;;  %v2669_v49 = vld [vmem:[#allocation13 + $0x8] sm:$0xff]   ;;  %v2671_v51 = vld [vmem:[#allocation13 + $0x10] sm:$0xff]   ;;  %v2673_v53 = vld [vmem:[#allocation13 + $0x18] sm:$0xff]  }
 0x121   : > { %2344 = vmatprep.subr.bf16.mxu0 %v2655_v27  ;;  %v2674_v54 = vld [vmem:[#allocation12 + $0x20] sm:$0xff]   ;;  %v2676_v56 = vld [vmem:[#allocation12 + $0x28] sm:$0xff]   ;;  %v2678_v58 = vld [vmem:[#allocation12 + $0x30] sm:$0xff]  }
 0x122   : > { %884 = vperm.xlu0 %2648, %v834_v32   ;;  %2373 = vmatpush3.bf16.msra.mxu1 %v2661_v35  ;;  %v2675_v55 = vld [vmem:[#allocation13 + $0x20] sm:$0xff]   ;;  %v2677_v57 = vld [vmem:[#allocation13 + $0x28] sm:$0xff]   ;;  %v2679_v59 = vld [vmem:[#allocation13 + $0x30] sm:$0xff]  }
 0x123   : > { %889 = vperm.xlu1 %2649, %v835_v33   ;;  %2374 = vmatprep.subr.bf16.mxu1 %v2662_v39  ;;  %v2680_v60 = vld [vmem:[#allocation12 + $0x38] sm:$0xff]   ;;  %v3421_v62 = vld [vmem:[#allocation17] ss:$8 sps:$4 sm:$0xff]   ;;  %v2684_v63 = vld [vmem:[#allocation17 + $0x4] ss:$8 sps:$4 sm:$0xff]  }
 0x124   : > { %2345 = vmatpush3.bf16.msra.mxu0 %v2655_v27  ;;  %v2681_v61 = vld [vmem:[#allocation13 + $0x38] sm:$0xff]   ;;  %v3429_v14 = vld [vmem:[#allocation17 + $0x24] ss:$8 sps:$4 sm:$0xff]   ;;  %v3432_v16 = vld [vmem:[#allocation17 + $0x20] ss:$8 sps:$4 sm:$0xff]  }
 0x125   : > { %2346 = vmatprep.subr.bf16.mxu0 %v2656_v29  ;;  %v3423_v0 = vld [vmem:[#allocation17 + $0x14] ss:$8 sps:$4 sm:$0xff]   ;;  %v3426_v13 = vld [vmem:[#allocation17 + $0x10] ss:$8 sps:$4 sm:$0xff]   ;;  %v3441_v19 = vld [vmem:[#allocation17 + $0x44] ss:$8 sps:$4 sm:$0xff]  }
 0x126   : > { %894 = vperm.xlu0 %2648, %v836_v37   ;;  %2375 = vmatpush3.bf16.msra.mxu1 %v2662_v39  ;;  %v3435_v17 = vld [vmem:[#allocation17 + $0x34] ss:$8 sps:$4 sm:$0xff]   ;;  %v3438_v18 = vld [vmem:[#allocation17 + $0x30] ss:$8 sps:$4 sm:$0xff]   ;;  %v3444_v20 = vld [vmem:[#allocation17 + $0x40] ss:$8 sps:$4 sm:$0xff]  }
 0x127   : > { %899 = vperm.xlu1 %2649, %v837_v38   ;;  %2376 = vmatprep.subr.bf16.mxu1 %v2663_v42  ;;  %v3447_v21 = vld [vmem:[#allocation17 + $0x54] ss:$8 sps:$4 sm:$0xff]   ;;  %v3450_v22 = vld [vmem:[#allocation17 + $0x50] ss:$8 sps:$4 sm:$0xff]   ;;  %v599_v35 = vld [vmem:[#allocation2 + $0x8] sm:$0xff] }
 0x128   : > { %2347 = vmatpush3.bf16.msra.mxu0 %v2656_v29  ;;  %v600_v29 = vld [vmem:[#allocation2 + $0x10] sm:$0xff]  ;;  %v598_v30 = vld [vmem:[#allocation2] sm:$0xff]  ;;  %v601_v32 = vld [vmem:[#allocation2 + $0x18] sm:$0xff] }
 0x129   : > { %2348 = vmatprep.subr.bf16.mxu0 %v2657_v36 }
 0x12a   : > { %904 = vperm.xlu0 %2648, %v838_v40   ;;  %2377 = vmatpush3.bf16.msra.mxu1 %v2663_v42 }
 0x12b   : > { %909 = vperm.xlu1 %2649, %v839_v41   ;;  %2378 = vmatprep.subr.bf16.mxu1 %v2664_v45 }
 0x12c   : > { %2349 = vmatpush3.bf16.msra.mxu0 %v2657_v36 }
 0x12d   : > { %1475 = vmatprep.subr.bf16.mxu0 %v2684_v63 }
 0x12e   : > { %914 = vperm.xlu0 %2648, %v840_v43   ;;  %2379 = vmatpush3.bf16.msra.mxu1 %v2664_v45  ;;  %v604_v45 = vld [vmem:[#allocation2 + $0x30] sm:$0xff] }
 0x12f   : > { %2351 = vmatmul.mubr.bf16.vlgmr.msra.gmra.mrb[0].mxu0 %v587_v6  ;;  %919 = vperm.xlu1 %2649, %v841_v44  }
 0x130   : > { %2354 = vmatprep.mubr.bf16.mxu0 %v588_v7  ;;  %2380 = vmatprep.subr.bf16.mxu1 %v2665_v46 }
 0x131   : > { %1476 = vmatpush1.bf16.msra.mxu0 %v3421_v62 }
 0x132   : > { %2381 = vmatpush3.bf16.msra.mxu1 %v2665_v46  ;;  %1477 = vmatprep.subr.bf16.mxu0 %v3423_v0 }
 0x133   : > { %2398 = vmatprep.subr.bf16.mxu1 %v2667_v47 }
 0x135   : > { %2383 = vmatmul.mubr.bf16.vlgmr.msra.gmra.mrb[0].mxu1 %v2668_v48  ;;  %1478 = vmatpush1.bf16.msra.mxu0 %v3426_v13  ;;  %v602_v48 = vld [vmem:[#allocation2 + $0x20] sm:$0xff] }
 0x136   : > { %2399 = vmatpush3.bf16.msra.mxu1 %v2667_v47  ;;  %2386 = vmatprep.mubr.bf16.mxu1 %v2670_v50 }
 0x137   : > { %2355 = vmatmul.mubr.bf16.gmra.mrb[4].mxu0 %v589_v8  ;;  %2400 = vmatprep.subr.bf16.mxu1 %v2669_v49 }
 0x138   : > { %2358 = vmatprep.mubr.bf16.mxu0 %v590_v9  ;;  %1479 = vmatprep.subr.bf16.mxu0 %v3429_v14 }
 0x139   : > { %1480 = vmatpush1.bf16.msra.mxu0 %v3432_v16 }
 0x13a   : > { %2401 = vmatpush3.bf16.msra.mxu1 %v2669_v49  ;;  %1481 = vmatprep.subr.bf16.mxu0 %v3435_v17 }
 0x13b   : > { %2402 = vmatprep.subr.bf16.mxu1 %v2671_v51 }
 0x13d   : > { %2387 = vmatmul.mubr.bf16.gmra.mrb[4].mxu1 %v2672_v52  ;;  %1482 = vmatpush1.bf16.msra.mxu0 %v3438_v18 }
 0x13e   : > { %2403 = vmatpush3.bf16.msra.mxu1 %v2671_v51  ;;  %2390 = vmatprep.mubr.bf16.mxu1 %v2674_v54  ;;  %v605_v51 = vld [vmem:[#allocation2 + $0x38] sm:$0xff] }
 0x13f   : > { %2359 = vmatmul.mubr.bf16.gmra.mrb[8].mxu0 %v591_v10  ;;  %2404 = vmatprep.subr.bf16.mxu1 %v2673_v53 }
 0x140   : > { %2362 = vmatprep.mubr.bf16.mxu0 %v592_v11  ;;  %1483 = vmatprep.subr.bf16.mxu0 %v3441_v19 }
 0x141   : > { %1484 = vmatpush1.bf16.msra.mxu0 %v3444_v20 }
 0x142   : > { %2405 = vmatpush3.bf16.msra.mxu1 %v2673_v53  ;;  %1485 = vmatprep.subr.bf16.mxu0 %v3447_v21 }
 0x143   : > { %2406 = vmatprep.subr.bf16.mxu1 %v2675_v55 }
 0x145   : > { %2391 = vmatmul.mubr.bf16.gmra.mrb[8].mxu1 %v2676_v56  ;;  %1486 = vmatpush1.bf16.msra.mxu0 %v3450_v22  ;;  %v603_v56 = vld [vmem:[#allocation2 + $0x28] sm:$0xff] }
 0x146   : > { %2407 = vmatpush3.bf16.msra.mxu1 %v2675_v55  ;;  %2394 = vmatprep.mubr.bf16.mxu1 %v2678_v58 }
 0x147   : > { %2363 = vmatmul.mubr.bf16.gmra.mrb[12].mxu0 %v593_v12  ;;  %2408 = vmatprep.subr.bf16.mxu1 %v2677_v57 }
 0x148   : > { %1507 = vmatprep.mubr.bf16.mxu0 %v3052_v15 }
 0x14a   : > { %2409 = vmatpush3.bf16.msra.mxu1 %v2677_v57 }
 0x14b   : > { %2410 = vmatprep.subr.bf16.mxu1 %v2679_v59 }
 0x14d   : > { %2395 = vmatmul.mubr.bf16.gmra.mrb[12].mxu1 %v2680_v60 }
 0x14e   : > { %2411 = vmatpush3.bf16.msra.mxu1 %v2679_v59 }
 0x14f   : > { %2412 = vmatprep.subr.bf16.mxu1 %v2681_v61 }
 0x152   : > { %2413 = vmatpush3.bf16.msra.mxu1 %v2681_v61 }
 0x153   : > { %2462 = vmatprep.subr.bf16.mxu1 %v2684_v63 }
 0x191   : > { %v845_v23 = vpop.permute.xlu0 %844 }
 0x192   : > { %v855_v24 = vpop.permute.xlu1 %854 }
 0x195   : > { %v850_v25 = vpop.permute.xlu0 %849 }
 0x196   : > { %v860_v26 = vpop.permute.xlu1 %859 }
 0x199   : > { %v865_v27 = vpop.permute.xlu0 %864 }
 0x19a   : > { %v870_v28 = vpop.permute.xlu1 %869 }
 0x19d   : > { %v875_v38 = vpop.permute.xlu0 %874 }
 0x19e   : > { %v880_v41 = vpop.permute.xlu1 %879 }
 0x1a1   : > { %v885_v53 = vpop.permute.xlu0 %884 }
 0x1a2   : > { %v890_v57 = vpop.permute.xlu1 %889 }
 0x202   : > { %v2352_v31 = vpop.f32.mrb[0].mxu0 }
 0x203   : > { %v777_v33 = vadd.f32 %v2352_v31, %v600_v29  ;;  %v712_v34 = vpop.f32.mrb[1].mxu0  ;;  %v606_v31 = vld [vmem:[#allocation2 + $0x40] sm:$0xff] }
 0x204   : > { %v775_v36 = vadd.f32 %v712_v34, %v598_v30  ;;  %v2353_v37 = vpop.f32.mrb[2].mxu0  ;;  %v895_v30 = vpop.permute.xlu0 %894 }
 0x205   : > { %793 = vst [vmem:[#allocation2 + $0x10] sm:$0xff] %v777_v33  ;;  %v778_v39 = vadd.f32 %v2353_v37, %v601_v32  ;;  %v715_v40 = vpop.f32.mrb[3].mxu0  ;;  %v924_v43 = vmul.f32 %v855_v24, %v777_v33  ;;  %v900_v33 = vpop.permute.xlu1 %899 }
 0x206   : > { %791 = vst [vmem:[#allocation2] sm:$0xff] %v775_v36  ;;  %v776_v42 = vadd.f32 %v715_v40, %v599_v35  ;;  %v922_v46 = vmul.f32 %v845_v23, %v775_v36  ;;  %v609_v35 = vld [vmem:[#allocation2 + $0x58] sm:$0xff] }
 0x207   : > { %794 = vst [vmem:[#allocation2 + $0x18] sm:$0xff] %v778_v39  ;;  %v925_v44 = vmul.f32 %v860_v26, %v778_v39  ;;  %v607_v39 = vld [vmem:[#allocation2 + $0x48] sm:$0xff] }
 0x208   : > { %792 = vst [vmem:[#allocation2 + $0x8] sm:$0xff] %v776_v42  ;;  %v923_v47 = vmul.f32 %v850_v25, %v776_v42  ;;  %v608_v25 = vld [vmem:[#allocation2 + $0x50] sm:$0xff] }
 0x209   : > { %v939_v49 = vpack.c.bf16 %v925_v44, %v924_v43  ;;  %v910_v43 = vpop.permute.xlu1 %909 }
 0x20a   : > { %v2356_v50 = vpop.f32.mrb[4].mxu0  ;;  %v938_v52 = vpack.c.bf16 %v923_v47, %v922_v46  ;;  %v610_v46 = vld [vmem:[#allocation2 + $0x60] sm:$0xff] }
 0x20b   : > { %v781_v54 = vadd.f32 %v2356_v50, %v604_v45  ;;  %v728_v55 = vpop.f32.mrb[5].mxu0 }
 0x20c   : > { %v779_v58 = vadd.f32 %v728_v55, %v602_v48  ;;  %v2357_v59 = vpop.f32.mrb[6].mxu0  ;;  %2414 = vmatprep.mubr.bf16.mxu1 %v938_v52  ;;  %v611_v52 = vld [vmem:[#allocation2 + $0x68] sm:$0xff] }
 0x20d   : > { %797 = vst [vmem:[#allocation2 + $0x30] sm:$0xff] %v781_v54  ;;  %v782_v60 = vadd.f32 %v2357_v59, %v605_v51  ;;  %v731_v61 = vpop.f32.mrb[7].mxu0  ;;  %2415 = vmatmul.mubr.bf16.vlgmr.msra.gmra.mrb[0].mxu1 %v939_v49  ;;  %v928_v23 = vmul.f32 %v875_v38, %v781_v54  ;;  %v613_v49 = vld [vmem:[#allocation2 + $0x78] sm:$0xff] }
 0x20e   : > { %795 = vst [vmem:[#allocation2 + $0x20] sm:$0xff] %v779_v58  ;;  %v780_v63 = vadd.f32 %v731_v61, %v603_v56  ;;  %2470 = vmatpush1.bf16.msra.mxu1 %v3421_v62  ;;  %v926_v26 = vmul.f32 %v865_v27, %v779_v58 }
 0x20f   : > { %798 = vst [vmem:[#allocation2 + $0x38] sm:$0xff] %v782_v60  ;;  %v929_v24 = vmul.f32 %v880_v41, %v782_v60  ;;  %2463 = vmatprep.subr.bf16.mxu1 %v3423_v0 }
 0x210   : > { %796 = vst [vmem:[#allocation2 + $0x28] sm:$0xff] %v780_v63  ;;  %v927_v29 = vmul.f32 %v870_v28, %v780_v63 }
 0x211   : > { %v941_v32 = vpack.c.bf16 %v929_v24, %v928_v23  ;;  %v2702_v23 = vld [vmem:[#allocation17 + $0x64] ss:$8 sps:$4 sm:$0xff]   ;;  %v2700_v24 = vld [vmem:[#allocation17 + $0x60] ss:$8 sps:$4 sm:$0xff]  }
 0x212   : > { %v2360_v34 = vpop.f32.mrb[8].mxu0  ;;  %v940_v36 = vpack.c.bf16 %v927_v29, %v926_v26  ;;  %2471 = vmatpush1.bf16.msra.mxu1 %v3426_v13  ;;  %v905_v13 = vpop.permute.xlu0 %904  ;;  %1487 = vmatprep.subr.bf16.mxu0 %v2702_v23 }
 0x213   : > { %v785_v37 = vadd.f32 %v2360_v34, %v608_v25  ;;  %v744_v62 = vpop.f32.mrb[9].mxu0  ;;  %2464 = vmatprep.subr.bf16.mxu1 %v3429_v14  ;;  %v612_v14 = vld [vmem:[#allocation2 + $0x70] sm:$0xff]  ;;  %1488 = vmatpush1.bf16.msra.mxu0 %v2700_v24 }
 0x214   : > { %v783_v38 = vadd.f32 %v744_v62, %v606_v31  ;;  %v2361_v0 = vpop.f32.mrb[10].mxu0  ;;  %2418 = vmatprep.mubr.bf16.mxu1 %v940_v36  ;;  %v2703_v25 = vld [vmem:[#allocation17 + $0x70] ss:$8 sps:$4 sm:$0xff]  }
 0x215   : > { %801 = vst [vmem:[#allocation2 + $0x50] sm:$0xff] %v785_v37  ;;  %v786_v27 = vadd.f32 %v2361_v0, %v609_v35  ;;  %v747_v28 = vpop.f32.mrb[11].mxu0  ;;  %2419 = vmatmul.mubr.bf16.gmra.mrb[4].mxu1 %v941_v32  ;;  %v932_v41 = vmul.f32 %v895_v30, %v785_v37 }
 0x216   : > { %799 = vst [vmem:[#allocation2 + $0x40] sm:$0xff] %v783_v38  ;;  %v784_v40 = vadd.f32 %v747_v28, %v607_v39  ;;  %2472 = vmatpush1.bf16.msra.mxu1 %v3432_v16  ;;  %v930_v44 = vmul.f32 %v885_v53, %v783_v38  ;;  %v915_v53 = vpop.permute.xlu0 %914 }
 0x217   : > { %802 = vst [vmem:[#allocation2 + $0x58] sm:$0xff] %v786_v27  ;;  %v933_v42 = vmul.f32 %v900_v33, %v786_v27  ;;  %2465 = vmatprep.subr.bf16.mxu1 %v3435_v17 }
 0x218   : > { %800 = vst [vmem:[#allocation2 + $0x48] sm:$0xff] %v784_v40  ;;  %v931_v45 = vmul.f32 %v890_v57, %v784_v40  ;;  %v920_v57 = vpop.permute.xlu1 %919 }
 0x219   : > { %v943_v47 = vpack.c.bf16 %v933_v42, %v932_v41 }
 0x21a   : > { %v2364_v48 = vpop.f32.mrb[12].mxu0  ;;  %v942_v50 = vpack.c.bf16 %v931_v45, %v930_v44  ;;  %2473 = vmatpush1.bf16.msra.mxu1 %v3438_v18 }
 0x21b   : > { %v789_v51 = vadd.f32 %v2364_v48, %v612_v14  ;;  %v760_v16 = vpop.f32.mrb[13].mxu0  ;;  %2466 = vmatprep.subr.bf16.mxu1 %v3441_v19 }
 0x21c   : > { %v787_v54 = vadd.f32 %v760_v16, %v610_v46  ;;  %v2365_v17 = vpop.f32.mrb[14].mxu0  ;;  %2422 = vmatprep.mubr.bf16.mxu1 %v942_v50 }
 0x21d   : > { %805 = vst [vmem:[#allocation2 + $0x70] sm:$0xff] %v789_v51  ;;  %v790_v55 = vadd.f32 %v2365_v17, %v613_v49  ;;  %v763_v56 = vpop.f32.mrb[15].mxu0  ;;  %2423 = vmatmul.mubr.bf16.gmra.mrb[8].mxu1 %v943_v47  ;;  %v936_v18 = vmul.f32 %v915_v53, %v789_v51 }
 0x21e   : > { %803 = vst [vmem:[#allocation2 + $0x60] sm:$0xff] %v787_v54  ;;  %v788_v58 = vadd.f32 %v763_v56, %v611_v52  ;;  %2474 = vmatpush1.bf16.msra.mxu1 %v3444_v20  ;;  %v934_v19 = vmul.f32 %v905_v13, %v787_v54  ;;  %v2705_v20 = vld [vmem:[#allocation17 + $0x74] ss:$8 sps:$4 sm:$0xff]  }
 0x21f   : > { %806 = vst [vmem:[#allocation2 + $0x78] sm:$0xff] %v790_v55  ;;  %v937_v59 = vmul.f32 %v920_v57, %v790_v55  ;;  %2467 = vmatprep.subr.bf16.mxu1 %v3447_v21  ;;  %1489 = vmatprep.subr.bf16.mxu0 %v2705_v20  ;;  %v2247_v21 = vld [vmem:[#allocation16] ss:$0 sm:$0xff] }
 0x220   : > { %804 = vst [vmem:[#allocation2 + $0x68] sm:$0xff] %v788_v58  ;;  %v935_v60 = vmul.f32 %v910_v43, %v788_v58  ;;  %1490 = vmatpush1.bf16.msra.mxu0 %v2703_v25 }
 0x221   : > { %v945_v61 = vpack.c.bf16 %v937_v59, %v936_v18 }
 0x222   : > { %v944_v63 = vpack.c.bf16 %v935_v60, %v934_v19  ;;  %2475 = vmatpush1.bf16.msra.mxu1 %v3450_v22 }
 0x223   : > { %2468 = vmatprep.subr.bf16.mxu1 %v2702_v23 }
 0x224   : > { %2426 = vmatprep.mubr.bf16.mxu1 %v944_v63 }
 0x225   : > { %2427 = vmatmul.mubr.bf16.gmra.mrb[12].mxu1 %v945_v61 }
 0x226   : > { %1567 = vmatprep.mubr.bf16.mxu1 %v3052_v15  ;;  %2476 = vmatpush1.bf16.msra.mxu1 %v2700_v24 }
 0x227   : > { %2469 = vmatprep.subr.bf16.mxu1 %v2705_v20 }
 0x22a   : > { %2477 = vmatpush1.bf16.msra.mxu1 %v2703_v25 }
 0x2e0   : > { %v2416_v26 = vpop.f32.mrb[0].mxu1 }
 0x2e1   : > { %v1341_v29 = vadd.f32 %v2416_v26, %v2247_v21  ;;  %v1269_v22 = vpop.f32.mrb[1].mxu1 }
 0x2e2   : > { %v1339_v30 = vadd.f32 %v2247_v21, %v1269_v22  ;;  %v2417_v31 = vpop.f32.mrb[2].mxu1 }
 0x2e3   : > { %v1342_v32 = vadd.f32 %v2417_v31, %v2247_v21  ;;  %v1272_v33 = vpop.f32.mrb[3].mxu1  ;;  %v1357_v35 = vmax.f32 %v1341_v29, 0.0 }
 0x2e4   : > { %v1340_v34 = vadd.f32 %v2247_v21, %v1272_v33  ;;  %v1355_v37 = vmax.f32 %v1339_v30, 0.0 }
 0x2e5   : > { %v1358_v36 = vmax.f32 %v1342_v32, 0.0 }
 0x2e6   : > { %v1356_v62 = vmax.f32 %v1340_v34, 0.0 }
 0x2e7   : > { %v1372_v39 = vpack.c.bf16 %v1358_v36, %v1357_v35 }
 0x2e8   : > { %v1371_v38 = vpack.c.bf16 %v1356_v62, %v1355_v37  ;;  %v2420_v0 = vpop.f32.mrb[4].mxu1 }
 0x2e9   : > { %v1345_v27 = vadd.f32 %v2420_v0, %v2247_v21  ;;  %v1285_v28 = vpop.f32.mrb[5].mxu1 }
 0x2ea   : > { %v1343_v40 = vadd.f32 %v2247_v21, %v1285_v28  ;;  %v2421_v41 = vpop.f32.mrb[6].mxu1  ;;  %1508 = vmatmul.mubr.bf16.vlgmr.msra.gmra.mrb[16].mxu0 %v1371_v38 }
 0x2eb   : > { %v1346_v42 = vadd.f32 %v2421_v41, %v2247_v21  ;;  %v1288_v13 = vpop.f32.mrb[7].mxu1  ;;  %1517 = vmatprep.mubr.bf16.mxu0 %v3052_v15  ;;  %v1361_v14 = vmax.f32 %v1345_v27, 0.0 }
 0x2ec   : > { %v1344_v43 = vadd.f32 %v2247_v21, %v1288_v13  ;;  %v1359_v45 = vmax.f32 %v1343_v40, 0.0 }
 0x2ed   : > { %v1362_v44 = vmax.f32 %v1346_v42, 0.0 }
 0x2ee   : > { %v1360_v46 = vmax.f32 %v1344_v43, 0.0 }
 0x2ef   : > { %v1374_v47 = vpack.c.bf16 %v1362_v44, %v1361_v14 }
 0x2f0   : > { %v1373_v48 = vpack.c.bf16 %v1360_v46, %v1359_v45  ;;  %v2424_v49 = vpop.f32.mrb[8].mxu1 }
 0x2f1   : > { %v1349_v50 = vadd.f32 %v2424_v49, %v2247_v21  ;;  %v1301_v51 = vpop.f32.mrb[9].mxu1 }
 0x2f2   : > { %v1347_v16 = vadd.f32 %v2247_v21, %v1301_v51  ;;  %v2425_v52 = vpop.f32.mrb[10].mxu1  ;;  %1518 = vmatmul.mubr.bf16.gmra.mrb[20].mxu0 %v1372_v39 }
 0x2f3   : > { %v1350_v54 = vadd.f32 %v2425_v52, %v2247_v21  ;;  %v1304_v17 = vpop.f32.mrb[11].mxu1  ;;  %1527 = vmatprep.mubr.bf16.mxu0 %v3052_v15  ;;  %v1365_v56 = vmax.f32 %v1349_v50, 0.0 }
 0x2f4   : > { %v1348_v55 = vadd.f32 %v2247_v21, %v1304_v17  ;;  %v1363_v57 = vmax.f32 %v1347_v16, 0.0 }
 0x2f5   : > { %v1366_v53 = vmax.f32 %v1350_v54, 0.0 }
 0x2f6   : > { %v1364_v58 = vmax.f32 %v1348_v55, 0.0 }
 0x2f7   : > { %v1376_v18 = vpack.c.bf16 %v1366_v53, %v1365_v56 }
 0x2f8   : > { %v1375_v59 = vpack.c.bf16 %v1364_v58, %v1363_v57  ;;  %v2428_v19 = vpop.f32.mrb[12].mxu1 }
 0x2f9   : > { %v1353_v60 = vadd.f32 %v2428_v19, %v2247_v21  ;;  %v1317_v61 = vpop.f32.mrb[13].mxu1 }
 0x2fa   : > { %v1351_v63 = vadd.f32 %v2247_v21, %v1317_v61  ;;  %v2429_v23 = vpop.f32.mrb[14].mxu1  ;;  %1528 = vmatmul.mubr.bf16.gmra.mrb[24].mxu0 %v1373_v48 }
 0x2fb   : > { %v1354_v24 = vadd.f32 %v2429_v23, %v2247_v21  ;;  %v1320_v20 = vpop.f32.mrb[15].mxu1  ;;  %1537 = vmatprep.mubr.bf16.mxu0 %v3052_v15  ;;  %v1369_v26 = vmax.f32 %v1353_v60, 0.0 }
 0x2fc   : > { %v1352_v25 = vadd.f32 %v2247_v21, %v1320_v20  ;;  %v1367_v22 = vmax.f32 %v1351_v63, 0.0 }
 0x2fd   : > { %v1370_v29 = vmax.f32 %v1354_v24, 0.0 }
 0x2fe   : > { %v1368_v30 = vmax.f32 %v1352_v25, 0.0 }
 0x2ff   : > { %v1378_v31 = vpack.c.bf16 %v1370_v29, %v1369_v26 }
 0x300   : > { %v1377_v32 = vpack.c.bf16 %v1368_v30, %v1367_v22 }
 0x302   : > { %1538 = vmatmul.mubr.bf16.gmra.mrb[28].mxu0 %v1374_v47  ;;  %1568 = vmatmul.mubr.bf16.vlgmr.msra.gmra.mrb[16].mxu1 %v1377_v32 }
 0x303   : > { %1547 = vmatprep.mubr.bf16.mxu0 %v3052_v15  ;;  %1577 = vmatprep.mubr.bf16.mxu1 %v3052_v15 }
 0x30a   : > { %1548 = vmatmul.mubr.bf16.gmra.mrb[32].mxu0 %v1375_v59  ;;  %1578 = vmatmul.mubr.bf16.gmra.mrb[20].mxu1 %v1378_v31 }
 0x30b   : > { %1557 = vmatprep.mubr.bf16.mxu0 %v3052_v15 }
 0x312   : > { %1558 = vmatmul.mubr.bf16.gmra.mrb[36].mxu0 %v1376_v18 }
 0x3bd   : > { %v1509_v33 = vpop.f32.mrb[16].mxu0 }
 0x3be   : > { %v1511_v34 = vpop.f32.mrb[17].mxu0 }
 0x3bf   : > { %1610 = vst [vmem:[#allocation5] sm:$0xff] %v1511_v34  ;;  %v1513_v21 = vpop.f32.mrb[18].mxu0 }
 0x3c0   : > { %v1589_v35 = vpack.c.bf16 %v1513_v21, %v1509_v33  ;;  %v1515_v36 = vpop.f32.mrb[19].mxu0 }
 0x3c1   : > { %1611 = vst [vmem:[#allocation5 + $0x8] sm:$0xff] %v1515_v36 }
 0x3c2   : > { %1601 = vst [vmem:[#allocation4] sm:$0xff] %v1589_v35 }
 0x3c5   : > { %v1519_v37 = vpop.f32.mrb[20].mxu0 }
 0x3c6   : > { %v1521_v62 = vpop.f32.mrb[21].mxu0 }
 0x3c7   : > { %1612 = vst [vmem:[#allocation5 + $0x10] sm:$0xff] %v1521_v62  ;;  %v1523_v39 = vpop.f32.mrb[22].mxu0 }
 0x3c8   : > { %v1590_v38 = vpack.c.bf16 %v1523_v39, %v1519_v37  ;;  %v1525_v0 = vpop.f32.mrb[23].mxu0 }
 0x3c9   : > { %1613 = vst [vmem:[#allocation5 + $0x18] sm:$0xff] %v1525_v0 }
 0x3ca   : > { %1602 = vst [vmem:[#allocation4 + $0x8] sm:$0xff] %v1590_v38 }
 0x3cd   : > { %v1529_v27 = vpop.f32.mrb[24].mxu0 }
 0x3ce   : > { %v1531_v28 = vpop.f32.mrb[25].mxu0 }
 0x3cf   : > { %1614 = vst [vmem:[#allocation5 + $0x20] sm:$0xff] %v1531_v28  ;;  %v1533_v15 = vpop.f32.mrb[26].mxu0 }
 0x3d0   : > { %v1591_v40 = vpack.c.bf16 %v1533_v15, %v1529_v27  ;;  %v1535_v41 = vpop.f32.mrb[27].mxu0 }
 0x3d1   : > { %1615 = vst [vmem:[#allocation5 + $0x28] sm:$0xff] %v1535_v41 }
 0x3d2   : > { %1603 = vst [vmem:[#allocation4 + $0x10] sm:$0xff] %v1591_v40 }
 0x3d5   : > { %v1539_v42 = vpop.f32.mrb[28].mxu0  ;;  %v1569_v13 = vpop.f32.mrb[16].mxu1 }
 0x3d6   : > { %v1541_v43 = vpop.f32.mrb[29].mxu0  ;;  %v1571_v14 = vpop.f32.mrb[17].mxu1 }
 0x3d7   : > { %1616 = vst [vmem:[#allocation5 + $0x30] sm:$0xff] %v1541_v43  ;;  %1622 = vst [vmem:[#allocation5 + $0x60] sm:$0xff] %v1571_v14  ;;  %v1543_v44 = vpop.f32.mrb[30].mxu0  ;;  %v1573_v45 = vpop.f32.mrb[18].mxu1 }
 0x3d8   : > { %v1592_v46 = vpack.c.bf16 %v1543_v44, %v1539_v42  ;;  %v1595_v47 = vpack.c.bf16 %v1573_v45, %v1569_v13  ;;  %v1545_v48 = vpop.f32.mrb[31].mxu0  ;;  %v1575_v49 = vpop.f32.mrb[19].mxu1 }
 0x3d9   : > { %1617 = vst [vmem:[#allocation5 + $0x38] sm:$0xff] %v1545_v48  ;;  %1623 = vst [vmem:[#allocation5 + $0x68] sm:$0xff] %v1575_v49 }
 0x3da   : > { %1604 = vst [vmem:[#allocation4 + $0x18] sm:$0xff] %v1592_v46  ;;  %1607 = vst [vmem:[#allocation4 + $0x30] sm:$0xff] %v1595_v47 }
 0x3dd   : > { %v1549_v50 = vpop.f32.mrb[32].mxu0  ;;  %v1579_v51 = vpop.f32.mrb[20].mxu1 }
 0x3de   : > { %v1551_v16 = vpop.f32.mrb[33].mxu0  ;;  %v1581_v52 = vpop.f32.mrb[21].mxu1 }
 0x3df   : > { %1618 = vst [vmem:[#allocation5 + $0x40] sm:$0xff] %v1551_v16  ;;  %1624 = vst [vmem:[#allocation5 + $0x70] sm:$0xff] %v1581_v52  ;;  %v1553_v54 = vpop.f32.mrb[34].mxu0  ;;  %v1583_v17 = vpop.f32.mrb[22].mxu1 }
 0x3e0   : > { %v1593_v55 = vpack.c.bf16 %v1553_v54, %v1549_v50  ;;  %v1596_v56 = vpack.c.bf16 %v1583_v17, %v1579_v51  ;;  %v1555_v53 = vpop.f32.mrb[35].mxu0  ;;  %v1585_v57 = vpop.f32.mrb[23].mxu1 }
 0x3e1   : > { %1619 = vst [vmem:[#allocation5 + $0x48] sm:$0xff] %v1555_v53  ;;  %1625 = vst [vmem:[#allocation5 + $0x78] sm:$0xff] %v1585_v57 }
 0x3e2   : > { %1605 = vst [vmem:[#allocation4 + $0x20] sm:$0xff] %v1593_v55  ;;  %1608 = vst [vmem:[#allocation4 + $0x38] sm:$0xff] %v1596_v56 }
 0x3e5   : > { %v1559_v58 = vpop.f32.mrb[36].mxu0 }
 0x3e6   : > { %v1561_v18 = vpop.f32.mrb[37].mxu0 }
 0x3e7   : > { %1620 = vst [vmem:[#allocation5 + $0x50] sm:$0xff] %v1561_v18  ;;  %v1563_v59 = vpop.f32.mrb[38].mxu0 }
 0x3e8   : > { %v1594_v19 = vpack.c.bf16 %v1563_v59, %v1559_v58  ;;  %v1565_v60 = vpop.f32.mrb[39].mxu0 }
 0x3e9   : > { %1621 = vst [vmem:[#allocation5 + $0x58] sm:$0xff] %v1565_v60 }
 0x3ea   : > { %1606 = vst [vmem:[#allocation4 + $0x28] sm:$0xff] %v1594_v19 }
 0x3eb PF: > { %p2264_p9 = scmp.ne.s32.totalorder %s3028_s30, 1 }
 0x3ec   : > { %v1651_v61 = vld [vmem:[#allocation4] sm:$0xff] (!%p2264_p9)  ;;  %v1652_v63 = vld [vmem:[#allocation4 + $0x8] sm:$0xff] (!%p2264_p9)  ;;  %2446 = vmatprep.mubr.bf16.mxu0 (!%p2264_p9), %v586_v5  ;;  %2454 = vmatprep.mubr.bf16.mxu1 (!%p2264_p9), %v590_v9  ;;  %v1810_v23 = vld [vmem:[#allocation9 + $0x10] sm:$0xff] (!%p2264_p9)  ;;  %v3053_v25 = vmov (!%p2264_p9), 0  }
 0x3ed   : > { %1629 = sbr.rel (%p2264_p9) target bundleno = 1272 (0x4f8), region = 108  ;;  %2430 = vmatprep.subr.bf16.mxu0 (!%p2264_p9), %v1651_v61  ;;  %2494 = vmatprep.subr.bf16.mxu1 (!%p2264_p9), %v1651_v61  ;;  %v1808_v24 = vld [vmem:[#allocation9] sm:$0xff] (!%p2264_p9)  ;;  %v1653_v20 = vld [vmem:[#allocation4 + $0x10] sm:$0xff] (!%p2264_p9)  ;;  %v1811_v5 = vld [vmem:[#allocation9 + $0x18] sm:$0xff] (!%p2264_p9) }
 0x3ee   : > { %2431 = vmatpush3.bf16.msra.mxu0 (!%p2264_p9), %v1651_v61  ;;  %2502 = vmatpush3.bf16.msra.mxu1 (!%p2264_p9), %v1651_v61  ;;  %v1809_v26 = vld [vmem:[#allocation9 + $0x8] sm:$0xff] (!%p2264_p9)  ;;  %v1654_v9 = vld [vmem:[#allocation4 + $0x18] sm:$0xff] (!%p2264_p9)  ;;  %v1812_v22 = vld [vmem:[#allocation9 + $0x20] sm:$0xff] (!%p2264_p9) }
 0x3ef   : > { %2432 = vmatprep.subr.bf16.mxu0 (!%p2264_p9), %v1652_v63  ;;  %2495 = vmatprep.subr.bf16.mxu1 (!%p2264_p9), %v1652_v63  ;;  %v1813_v29 = vld [vmem:[#allocation9 + $0x28] sm:$0xff] (!%p2264_p9)  ;;  %v1655_v30 = vld [vmem:[#allocation4 + $0x20] sm:$0xff] (!%p2264_p9)  ;;  %v1815_v31 = vld [vmem:[#allocation9 + $0x38] sm:$0xff] (!%p2264_p9) }
 0x3f0   : > { %2707 = vset.pattern.permute.xlu1 (!%p2264_p9), %v3053_v25  ;;  %2706 = vset.pattern.permute.xlu0 (!%p2264_p9), %v3053_v25  ;;  %v1814_v32 = vld [vmem:[#allocation9 + $0x30] sm:$0xff] (!%p2264_p9)  ;;  %v1817_v34 = vld [vmem:[#allocation9 + $0x48] sm:$0xff] (!%p2264_p9)  ;;  %v1816_v21 = vld [vmem:[#allocation9 + $0x40] sm:$0xff] (!%p2264_p9) }
 0x3f1   : > { %1836 = vperm.xlu1 (!%p2264_p9), %2707, %v1810_v23   ;;  %1826 = vperm.xlu0 (!%p2264_p9), %2706, %v1808_v24   ;;  %v1656_v33 = vld [vmem:[#allocation4 + $0x28] sm:$0xff] (!%p2264_p9)  ;;  %v1657_v35 = vld [vmem:[#allocation4 + $0x30] sm:$0xff] (!%p2264_p9)  ;;  %v1819_v36 = vld [vmem:[#allocation9 + $0x58] sm:$0xff] (!%p2264_p9) }
 0x3f2   : > { %2433 = vmatpush3.bf16.msra.mxu0 (!%p2264_p9), %v1652_v63  ;;  %2503 = vmatpush3.bf16.msra.mxu1 (!%p2264_p9), %v1652_v63  ;;  %v1818_v37 = vld [vmem:[#allocation9 + $0x50] sm:$0xff] (!%p2264_p9)  ;;  %v1658_v62 = vld [vmem:[#allocation4 + $0x38] sm:$0xff] (!%p2264_p9)  ;;  %v1821_v39 = vld [vmem:[#allocation9 + $0x68] sm:$0xff] (!%p2264_p9) }
 0x3f3   : > { %2434 = vmatprep.subr.bf16.mxu0 (!%p2264_p9), %v1653_v20  ;;  %2496 = vmatprep.subr.bf16.mxu1 (!%p2264_p9), %v1653_v20  ;;  %v1820_v38 = vld [vmem:[#allocation9 + $0x60] sm:$0xff] (!%p2264_p9)  ;;  %v1823_v0 = vld [vmem:[#allocation9 + $0x78] sm:$0xff] (!%p2264_p9)  ;;  %v1822_v27 = vld [vmem:[#allocation9 + $0x70] sm:$0xff] (!%p2264_p9) }
 0x3f4   : > { %v1633_v2 = vld [vmem:[#allocation3 + $0x10] sm:$0xff]  ;;  %v1639_v43 = vld [vmem:[#allocation3 + $0x40] sm:$0xff]  ;;  %v1634_v45 = vld [vmem:[#allocation3 + $0x18] sm:$0xff] }
 0x3f5   : > { %1841 = vperm.xlu1 %2707, %v1811_v5   ;;  %1831 = vperm.xlu0 %2706, %v1809_v26   ;;  %v1642_v46 = vld [vmem:[#allocation3 + $0x58] sm:$0xff]  ;;  %v1632_v51 = vld [vmem:[#allocation3 + $0x8] sm:$0xff]  ;;  %v1923_v52 = vld [vmem:[#allocation5 + $0x10] sm:$0xff] }
 0x3f6   : > { %2435 = vmatpush3.bf16.msra.mxu0 %v1653_v20  ;;  %2504 = vmatpush3.bf16.msra.mxu1 %v1653_v20  ;;  %v1640_v16 = vld [vmem:[#allocation3 + $0x48] sm:$0xff]  ;;  %v1931_v54 = vld [vmem:[#allocation5 + $0x50] sm:$0xff]  ;;  %v1921_v18 = vld [vmem:[#allocation5] sm:$0xff] }
 0x3f7   : > { %2436 = vmatprep.subr.bf16.mxu0 %v1654_v9  ;;  %2497 = vmatprep.subr.bf16.mxu1 %v1654_v9  ;;  %v1929_v59 = vld [vmem:[#allocation5 + $0x40] sm:$0xff]  ;;  %v1924_v25 = vld [vmem:[#allocation5 + $0x18] sm:$0xff] }
 0x3f8   : > { %v3499_v23 = vld [vmem:[#allocation19] ss:$0 sm:$0xff]  ;;  %v1932_v5 = vld [vmem:[#allocation5 + $0x58] sm:$0xff] }
 0x3f9   : > { %1851 = vperm.xlu1 %2707, %v1813_v29   ;;  %1846 = vperm.xlu0 %2706, %v1812_v22  }
 0x3fa   : > { %2437 = vmatpush3.bf16.msra.mxu0 %v1654_v9  ;;  %2505 = vmatpush3.bf16.msra.mxu1 %v1654_v9 }
 0x3fb   : > { %2438 = vmatprep.subr.bf16.mxu0 %v1655_v30  ;;  %2498 = vmatprep.subr.bf16.mxu1 %v1655_v30 }
 0x3fd   : > { %1861 = vperm.xlu1 %2707, %v1815_v31   ;;  %1856 = vperm.xlu0 %2706, %v1814_v32   ;;  %v1922_v32 = vld [vmem:[#allocation5 + $0x8] sm:$0xff] }
 0x3fe   : > { %2439 = vmatpush3.bf16.msra.mxu0 %v1655_v30  ;;  %2506 = vmatpush3.bf16.msra.mxu1 %v1655_v30 }
 0x3ff   : > { %2440 = vmatprep.subr.bf16.mxu0 %v1656_v33  ;;  %2499 = vmatprep.subr.bf16.mxu1 %v1656_v33 }
 0x401   : > { %1871 = vperm.xlu1 %2707, %v1817_v34   ;;  %1866 = vperm.xlu0 %2706, %v1816_v21  }
 0x402   : > { %2441 = vmatpush3.bf16.msra.mxu0 %v1656_v33  ;;  %2507 = vmatpush3.bf16.msra.mxu1 %v1656_v33  ;;  %v1930_v33 = vld [vmem:[#allocation5 + $0x48] sm:$0xff] }
 0x403   : > { %2442 = vmatprep.subr.bf16.mxu0 %v1657_v35  ;;  %2500 = vmatprep.subr.bf16.mxu1 %v1657_v35 }
 0x405   : > { %1881 = vperm.xlu1 %2707, %v1819_v36   ;;  %1876 = vperm.xlu0 %2706, %v1818_v37  }
 0x406   : > { %2443 = vmatpush3.bf16.msra.mxu0 %v1657_v35  ;;  %2508 = vmatpush3.bf16.msra.mxu1 %v1657_v35 }
 0x407   : > { %2444 = vmatprep.subr.bf16.mxu0 %v1658_v62  ;;  %2501 = vmatprep.subr.bf16.mxu1 %v1658_v62 }
 0x409   : > { %1891 = vperm.xlu1 %2707, %v1821_v39   ;;  %1886 = vperm.xlu0 %2706, %v1820_v38   ;;  %v1645_v39 = vld [vmem:[#allocation3 + $0x70] sm:$0xff] }
 0x40a   : > { %2445 = vmatpush3.bf16.msra.mxu0 %v1658_v62  ;;  %2509 = vmatpush3.bf16.msra.mxu1 %v1658_v62  ;;  %v1637_v62 = vld [vmem:[#allocation3 + $0x30] sm:$0xff] }
 0x40d   : > { %2447 = vmatmul.mubr.bf16.vlgmr.msra.gmra.mrb[0].mxu0 %v587_v6  ;;  %2455 = vmatmul.mubr.bf16.vlgmr.msra.gmra.mrb[0].mxu1 %v591_v10 }
 0x40e   : > { %2450 = vmatprep.mubr.bf16.mxu0 %v588_v7  ;;  %2458 = vmatprep.mubr.bf16.mxu1 %v592_v11 }
 0x40f   : > { %1901 = vperm.xlu1 %2707, %v1823_v0   ;;  %1896 = vperm.xlu0 %2706, %v1822_v27  }
 0x415   : > { %2451 = vmatmul.mubr.bf16.gmra.mrb[4].mxu0 %v589_v8  ;;  %2459 = vmatmul.mubr.bf16.gmra.mrb[4].mxu1 %v593_v12  ;;  %v1641_v8 = vld [vmem:[#allocation3 + $0x50] sm:$0xff]  ;;  %v1631_v12 = vld [vmem:[#allocation3] sm:$0xff] }
 0x470   : > { %v1827_v28 = vpop.permute.xlu0 %1826  ;;  %v1837_v1 = vpop.permute.xlu1 %1836 }
 0x474   : > { %v1832_v6 = vpop.permute.xlu0 %1831  ;;  %v1842_v15 = vpop.permute.xlu1 %1841 }
 0x478   : > { %v3489_v3 = vpop.permute.xlu0 %1846  ;;  %v3491_v10 = vpop.permute.xlu1 %1851 }
 0x47c   : > { %v3493_v7 = vpop.permute.xlu0 %1856  ;;  %v3495_v40 = vpop.permute.xlu1 %1861 }
 0x480   : > { %v1867_v11 = vpop.permute.xlu0 %1866  ;;  %v1872_v41 = vpop.permute.xlu1 %1871 }
 0x484   : > { %v1877_v42 = vpop.permute.xlu0 %1876  ;;  %v1882_v13 = vpop.permute.xlu1 %1881 }
 0x488   : > { %v3497_v4 = vpop.permute.xlu0 %1886  ;;  %v3501_v34 = vpop.permute.xlu1 %1891 }
 0x48e   : > { %v1897_v38 = vpop.permute.xlu0 %1896 }
 0x4e0   : > { %v2448_v14 = vpop.f32.mrb[0].mxu0  ;;  %v2456_v44 = vpop.f32.mrb[0].mxu1 }
 0x4e1   : > { %v1758_v47 = vadd.f32 %v2448_v14, %v1633_v2  ;;  %v1766_v48 = vadd.f32 %v2456_v44, %v1641_v8  ;;  %v1693_v49 = vpop.f32.mrb[1].mxu0  ;;  %v1725_v50 = vpop.f32.mrb[1].mxu1 }
 0x4e2   : > { %v1756_v17 = vadd.f32 %v1693_v49, %v1631_v12  ;;  %v1764_v55 = vadd.f32 %v1725_v50, %v1639_v43  ;;  %v2449_v56 = vpop.f32.mrb[2].mxu0  ;;  %v2457_v53 = vpop.f32.mrb[2].mxu1  ;;  %v1646_v43 = vld [vmem:[#allocation3 + $0x78] sm:$0xff]  ;;  %v1636_v49 = vld [vmem:[#allocation3 + $0x28] sm:$0xff] }
 0x4e3   : > { %1774 = vst [vmem:[#allocation3 + $0x10] sm:$0xff] %v1758_v47  ;;  %v1906_v57 = vmul.f32 %v1837_v1, %v1758_v47  ;;  %1782 = vst [vmem:[#allocation3 + $0x50] sm:$0xff] %v1766_v48  ;;  %v1914_v58 = vmul.f32 %v1877_v42, %v1766_v48  ;;  %v1759_v19 = vadd.f32 %v2449_v56, %v1634_v45  ;;  %v1696_v61 = vpop.f32.mrb[3].mxu0  ;;  %v1728_v63 = vpop.f32.mrb[3].mxu1  ;;  %v1644_v50 = vld [vmem:[#allocation3 + $0x68] sm:$0xff] }
 0x4e4   : > { %v1767_v60 = vadd.f32 %v2457_v53, %v1642_v46  ;;  %1772 = vst [vmem:[#allocation3] sm:$0xff] %v1756_v17  ;;  %v1904_v24 = vmul.f32 %v1827_v28, %v1756_v17  ;;  %1780 = vst [vmem:[#allocation3 + $0x40] sm:$0xff] %v1764_v55  ;;  %v1912_v20 = vmul.f32 %v1867_v11, %v1764_v55  ;;  %v1643_v11 = vld [vmem:[#allocation3 + $0x60] sm:$0xff] }
 0x4e5   : > { %v1757_v26 = vadd.f32 %v1696_v61, %v1632_v51  ;;  %v1765_v9 = vadd.f32 %v1728_v63, %v1640_v16  ;;  %v1939_v29 = vadd.f32 %v1923_v52, %v1906_v57  ;;  %v1947_v22 = vadd.f32 %v1931_v54, %v1914_v58  ;;  %1775 = vst [vmem:[#allocation3 + $0x18] sm:$0xff] %v1759_v19  ;;  %v1927_v52 = vld [vmem:[#allocation5 + $0x30] sm:$0xff] }
 0x4e6   : > { %v1907_v30 = vmul.f32 %v1842_v15, %v1759_v19  ;;  %1783 = vst [vmem:[#allocation3 + $0x58] sm:$0xff] %v1767_v60  ;;  %v1915_v31 = vmul.f32 %v1882_v13, %v1767_v60  ;;  %v1937_v21 = vadd.f32 %v1921_v18, %v1904_v24  ;;  %v1945_v35 = vadd.f32 %v1929_v59, %v1912_v20  ;;  %v1635_v15 = vld [vmem:[#allocation3 + $0x20] sm:$0xff]  ;;  %v1935_v54 = vld [vmem:[#allocation5 + $0x70] sm:$0xff]  ;;  %v1902_v24 = vpop.permute.xlu1 %1901 }
 0x4e7   : > { %1773 = vst [vmem:[#allocation3 + $0x8] sm:$0xff] %v1757_v26  ;;  %v1905_v36 = vmul.f32 %v1832_v6, %v1757_v26  ;;  %1781 = vst [vmem:[#allocation3 + $0x48] sm:$0xff] %v1765_v9  ;;  %v1913_v37 = vmul.f32 %v1872_v41, %v1765_v9  ;;  %v1962_v0 = vadd.f32 %v3499_v23, %v1939_v29  ;;  %v1638_v41 = vld [vmem:[#allocation3 + $0x38] sm:$0xff]  ;;  %v1925_v18 = vld [vmem:[#allocation5 + $0x20] sm:$0xff] }
 0x4e8   : > { %v1970_v27 = vadd.f32 %v3499_v23, %v1947_v22  ;;  %v1940_v28 = vadd.f32 %v1924_v25, %v1907_v30  ;;  %v1948_v1 = vadd.f32 %v1932_v5, %v1915_v31  ;;  %v1960_v42 = vadd.f32 %v3499_v23, %v1937_v21  ;;  %v2452_v6 = vpop.f32.mrb[4].mxu0  ;;  %v2460_v12 = vpop.f32.mrb[4].mxu1  ;;  %v1933_v59 = vld [vmem:[#allocation5 + $0x60] sm:$0xff]  ;;  %v1928_v5 = vld [vmem:[#allocation5 + $0x38] sm:$0xff] }
 0x4e9   : > { %v1968_v2 = vadd.f32 %v3499_v23, %v1945_v35  ;;  %v1938_v8 = vadd.f32 %v1922_v32, %v1905_v36  ;;  %v1946_v13 = vadd.f32 %v1930_v33, %v1913_v37  ;;  %1978 = vst [vmem:[#allocation20 + $0x10] sm:$0xff] %v1962_v0  ;;  %v1762_v45 = vadd.f32 %v2452_v6, %v1637_v62  ;;  %v1709_v47 = vpop.f32.mrb[5].mxu0  ;;  %v1741_v48 = vpop.f32.mrb[5].mxu1  ;;  %v1936_v26 = vld [vmem:[#allocation5 + $0x78] sm:$0xff]  ;;  %v1926_v32 = vld [vmem:[#allocation5 + $0x28] sm:$0xff] }
 0x4ea   : > { %1986 = vst [vmem:[#allocation20 + $0x50] sm:$0xff] %v1970_v27  ;;  %v1963_v14 = vadd.f32 %v3499_v23, %v1940_v28  ;;  %v1971_v44 = vadd.f32 %v3499_v23, %v1948_v1  ;;  %v1770_v46 = vadd.f32 %v2460_v12, %v1645_v39  ;;  %1976 = vst [vmem:[#allocation20] sm:$0xff] %v1960_v42  ;;  %v2453_v56 = vpop.f32.mrb[6].mxu0  ;;  %v2461_v53 = vpop.f32.mrb[6].mxu1  ;;  %v1934_v33 = vld [vmem:[#allocation5 + $0x68] sm:$0xff] }
 0x4eb   : > { %1984 = vst [vmem:[#allocation20 + $0x40] sm:$0xff] %v1968_v2  ;;  %v1961_v51 = vadd.f32 %v3499_v23, %v1938_v8  ;;  %v1969_v16 = vadd.f32 %v3499_v23, %v1946_v13  ;;  %v1760_v17 = vadd.f32 %v1709_v47, %v1635_v15  ;;  %v1768_v55 = vadd.f32 %v1741_v48, %v1643_v11  ;;  %v1712_v61 = vpop.f32.mrb[7].mxu0  ;;  %v1744_v63 = vpop.f32.mrb[7].mxu1 }
 0x4ec   : > { %1979 = vst [vmem:[#allocation20 + $0x18] sm:$0xff] %v1963_v14  ;;  %1987 = vst [vmem:[#allocation20 + $0x58] sm:$0xff] %v1971_v44  ;;  %v1910_v57 = vmul.f32 %v3493_v7, %v1762_v45  ;;  %v1918_v58 = vmul.f32 %v1897_v38, %v1770_v46  ;;  %v1763_v19 = vadd.f32 %v2453_v56, %v1638_v41 }
 0x4ed   : > { %1778 = vst [vmem:[#allocation3 + $0x30] sm:$0xff] %v1762_v45  ;;  %1786 = vst [vmem:[#allocation3 + $0x70] sm:$0xff] %v1770_v46  ;;  %v1771_v60 = vadd.f32 %v2461_v53, %v1646_v43  ;;  %v1908_v20 = vmul.f32 %v3489_v3, %v1760_v17  ;;  %v1916_v25 = vmul.f32 %v3497_v4, %v1768_v55 }
 0x4ee   : > { %1977 = vst [vmem:[#allocation20 + $0x8] sm:$0xff] %v1961_v51  ;;  %1985 = vst [vmem:[#allocation20 + $0x48] sm:$0xff] %v1969_v16  ;;  %v1761_v7 = vadd.f32 %v1712_v61, %v1636_v49  ;;  %v1769_v9 = vadd.f32 %v1744_v63, %v1644_v50  ;;  %v1943_v29 = vadd.f32 %v1927_v52, %v1910_v57 }
 0x4ef   : > { %1776 = vst [vmem:[#allocation3 + $0x20] sm:$0xff] %v1760_v17  ;;  %1784 = vst [vmem:[#allocation3 + $0x60] sm:$0xff] %v1768_v55  ;;  %v1951_v22 = vadd.f32 %v1935_v54, %v1918_v58  ;;  %v1911_v30 = vmul.f32 %v3495_v40, %v1763_v19  ;;  %v1919_v31 = vmul.f32 %v1902_v24, %v1771_v60 }
 0x4f0   : > { %1779 = vst [vmem:[#allocation3 + $0x38] sm:$0xff] %v1763_v19  ;;  %1787 = vst [vmem:[#allocation3 + $0x78] sm:$0xff] %v1771_v60  ;;  %v1941_v21 = vadd.f32 %v1925_v18, %v1908_v20  ;;  %v1949_v35 = vadd.f32 %v1933_v59, %v1916_v25  ;;  %v1909_v3 = vmul.f32 %v3491_v10, %v1761_v7 }
 0x4f1   : > { %1777 = vst [vmem:[#allocation3 + $0x28] sm:$0xff] %v1761_v7  ;;  %1785 = vst [vmem:[#allocation3 + $0x68] sm:$0xff] %v1769_v9  ;;  %v1917_v4 = vmul.f32 %v3501_v34, %v1769_v9  ;;  %v1966_v36 = vadd.f32 %v3499_v23, %v1943_v29  ;;  %v1974_v37 = vadd.f32 %v3499_v23, %v1951_v22 }
 0x4f2   : > { %v1944_v62 = vadd.f32 %v1928_v5, %v1911_v30  ;;  %v1952_v39 = vadd.f32 %v1936_v26, %v1919_v31  ;;  %v1964_v40 = vadd.f32 %v3499_v23, %v1941_v21  ;;  %v1972_v38 = vadd.f32 %v3499_v23, %v1949_v35 }
 0x4f3   : > { %v1942_v0 = vadd.f32 %v1926_v32, %v1909_v3  ;;  %v1950_v27 = vadd.f32 %v1934_v33, %v1917_v4  ;;  %1982 = vst [vmem:[#allocation20 + $0x30] sm:$0xff] %v1966_v36  ;;  %1990 = vst [vmem:[#allocation20 + $0x70] sm:$0xff] %v1974_v37 }
 0x4f4   : > { %v1967_v28 = vadd.f32 %v3499_v23, %v1944_v62  ;;  %v1975_v10 = vadd.f32 %v3499_v23, %v1952_v39  ;;  %1980 = vst [vmem:[#allocation20 + $0x20] sm:$0xff] %v1964_v40  ;;  %1988 = vst [vmem:[#allocation20 + $0x60] sm:$0xff] %v1972_v38 }
 0x4f5   : > { %v1965_v34 = vadd.f32 %v3499_v23, %v1942_v0  ;;  %v1973_v1 = vadd.f32 %v3499_v23, %v1950_v27 }
 0x4f6   : > { %1983 = vst [vmem:[#allocation20 + $0x38] sm:$0xff] %v1967_v28  ;;  %1991 = vst [vmem:[#allocation20 + $0x78] sm:$0xff] %v1975_v10 }
 0x4f7   : > { %1981 = vst [vmem:[#allocation20 + $0x28] sm:$0xff] %v1965_v34  ;;  %1989 = vst [vmem:[#allocation20 + $0x68] sm:$0xff] %v1973_v1 }
 0x4f8 PF: > { %p2602_p10 = scmp.eq.s32.totalorder %s3123_s12, 1  ;;  %s3054_s30 = smov [#allocation20]  }
 0x4f9   : > { %s2007_s15 = sshll.u32 %s3054_s30, 4  ;;  %s2008_s15 = int_to_ptr.vmem [resolvable:$true] %s2007_s15 }
 0x4fa   : > { %s2960_s22 = scalar_lea.vmem %s2008_s15, 2048  ;;  %s2966_s23 = scalar_lea.vmem %s2008_s15, 4096 }
 0x4fb   : > { %p2961_p11 = scmp.ne.s32.totalorder %s2008_s15, %s2960_s22  ;;  %p2967_p6 = scmp.lt.s32.totalorder %s2008_s15, %s2008_s15 }
 0x4fc   : > { %p2968_p7 = scmp.lt.s32.totalorder %s2966_s23, %s2960_s22 }
 0x4fd   : > { %p2962_p12 = pnand %p2961_p11, %p2602_p10 }
 0x4fe   : > { %p2969_p0 = por %p2968_p7, %p2967_p6 }
 0x4ff   : > { %p2963_p13 = pneg %p2962_p12 }
 0x501   : > { %p2970_p1 = pnand %p2969_p0, %p2963_p13 }
 0x503   : > { %2973 = shalt.err (!%p2970_p1)
}
 0x504   : > { %s2974_s5 = scalar_lea.hbm %s3566_s9, 2048 }
 0x505   : > { %p2975_p2 = scmp.ne.s32.totalorder %s3566_s9, %s2974_s5  ;;  %p2980_p4 = scmp.lt.u32.totalorder %s2974_s5, %s3566_s9 }
 0x507   : > { %p2976_p5 = pnand %p2975_p2, %p2602_p10 }
 0x509   : > { %p2977_p3 = pneg %p2976_p5 }
 0x50b   : > { %p2982_p8 = pnand %p2980_p4, %p2977_p3 }
 0x50d   : > { %2985 = shalt.err (!%p2982_p8)
}
 0x50e   : > { %s3055_s29 = smov 128   ;;  %s3056_s28 = smov 8  }
 0x50f   : > { %2547 = dma.vmem_to_hbm [thread:$0]  (%p2602_p10), %s2008_s15, 2048, %s3566_s9, [#allocation8], %s3055_s29, %s3055_s29, %s3056_s28  }
 0x510 PF: > { %s3611_s7 = sadd.s32 4294967294, %s3036_s11   ;;  %p3612_p11 = scmp.ge.s32.totalorder %s3036_s11, 2 }
 0x511   : > { %p2604_p9 = scmp.eq.s32.totalorder %s3611_s7, 1 }
 0x513   : > { %p2580_p12 = pnand %p2604_p9, %p3612_p11 }
 0x515   : > { %3023 = dma.done.wait (!%p2580_p12), [#allocation8], 2048  }
 0x516   : > { %3025 = vsyncadd (!%p2580_p12), [#allocation8], 4294965248  ;;  %s26_s11 = sadd.s32 1, %s3036_s11   ;;  %s3613_s30 = smov %s3032_s10 }
 0x517   : > { %p23_p13 = scmp.ge.s32.totalorder %s26_s11, 4   ;;  %s3614_s10 = smov %s3616_s14 }
 0x519   :  { %25 = sbr.rel (!%p23_p13) target bundleno = 12 (0xc), region = 165 }
 0x520   :  { %2028 = vsyncpa [#allocation7], 1 }
 0x521   :  { %2030 = vsyncpa [#allocation7 + $0x1], 1 }
 0x522   :  { %2031 = vsyncpa [#allocation10], 1 }
 0x523   :  { %2032 = vsyncpa [#allocation15], 1 }
 0x524   :  { %2033 = vsyncpa [#allocation18], 1 }
 0x525   :  { %2034 = vsyncpa [#allocation8], 1 }
 0x526   :  { %2036 = vsyncpa [#allocation8 + $0x1], 1 }

</bundles_post_ra>
